<compile_context>
chip_gen: v7x
topology: tpu7x:2x2x1
jax: 0.10.0
libtpu: 0.0.40
codegen_flags: <defaults>
</compile_context>

<pallas_src>
import functools

import jax
import jax.numpy as jnp
from jax.experimental import pallas as pl
from jax.experimental.pallas import tpu as pltpu


# ----------------------------------------------------------------------------
# Small helpers
# ----------------------------------------------------------------------------
def _round_up(x, m):
    return (x + m - 1) // m * m


def _pick_n_tile(n_pad):
    for t in (512, 384, 256, 128):
        if n_pad % t == 0:
            return t
    return n_pad  # unreachable: n_pad is a multiple of 128


def _pick_c_tile(c):
    for t in (512, 384, 256, 128):
        if c % t == 0:
            return t
    return c      # c < 128 or no 128-multiple divisor: block == full channel dim


def _conv_m_tile(m, kp, tn):
    """Row tile for the conv matmul: big for shallow K, bounded by a VMEM budget."""
    cap = 2048 if kp <= 512 else (1024 if kp <= 1536 else 512)
    budget = 12 * 1024 * 1024  # double-buffered bf16 blocks, fits v5e 16MiB default
    while cap > 64 and 4 * (cap * kp + kp * tn + cap * tn) > budget:
        cap //= 2
    if m <= cap:
        return _round_up(m, 16)
    nt = -(-m // cap)
    return _round_up(-(-m // nt), 16)


def _pool_m_tile(m, taps, tc):
    cap = 512
    budget = 8 * 1024 * 1024
    while cap > 64 and 2 * (taps + 1) * cap * tc * 2 > budget:
        cap //= 2
    if m <= cap:
        return _round_up(m, 16)
    nt = -(-m // cap)
    return _round_up(-(-m // nt), 16)


# ----------------------------------------------------------------------------
# Pallas kernels
# ----------------------------------------------------------------------------
def _matmul_bn_kernel(x_ref, w_ref, s_ref, b_ref, o_ref, *, relu):
    """conv-as-matmul with fused folded-BN scale/bias + ReLU; bf16 in/out, f32 acc.

    x_ref: [tm, K] bf16; w_ref: [K, tn] bf16; s_ref/b_ref: [1, tn] f32; o_ref: [tm, tn] bf16.
    """
    acc = jnp.dot(x_ref[...], w_ref[...], preferred_element_type=jnp.float32)
    y = acc * s_ref[...] + b_ref[...]
    if relu:
        y = jnp.maximum(y, 0.0)
    o_ref[...] = y.astype(o_ref.dtype)


def _pool_reduce_kernel(x_ref, o_ref, *, op, inv):
    """Max / avg pooling over pre-sliced taps. x_ref: [T, tm, tc] bf16; o_ref: [tm, tc] bf16."""
    nt = x_ref.shape[0]
    if op == "max":
        acc = x_ref[0]
        for t in range(1, nt):
            acc = jnp.maximum(acc, x_ref[t])
        o_ref[...] = acc
    else:
        acc = x_ref[0].astype(jnp.float32)
        for t in range(1, nt):
            acc = acc + x_ref[t].astype(jnp.float32)
        o_ref[...] = (acc * inv).astype(o_ref.dtype)


def _gap_kernel(x_ref, o_ref, *, inv):
    """Global average pool. x_ref: [B, HWp, tc] bf16; o_ref: [B, tc] f32."""
    o_ref[...] = jnp.sum(x_ref[...].astype(jnp.float32), axis=1) * inv


# ----------------------------------------------------------------------------
# Cached pallas_call builders (one compile per unique shape configuration)
# ----------------------------------------------------------------------------
@functools.lru_cache(maxsize=None)
def _build_conv_call(mp, kp, n_pad, tm, tn, relu):
    flops = 2 * mp * kp * n_pad
    bytes_accessed = 2 * (mp * kp + kp * n_pad + mp * n_pad) + 8 * n_pad
    fn = pl.pallas_call(
        functools.partial(_matmul_bn_kernel, relu=relu),
        out_shape=jax.ShapeDtypeStruct((mp, n_pad), jnp.bfloat16),
        grid=(mp // tm, n_pad // tn),
        in_specs=[
            pl.BlockSpec((tm, kp), lambda mi, ni: (mi, 0)),
            pl.BlockSpec((kp, tn), lambda mi, ni: (0, ni)),
            pl.BlockSpec((1, tn), lambda mi, ni: (0, ni)),
            pl.BlockSpec((1, tn), lambda mi, ni: (0, ni)),
        ],
        out_specs=pl.BlockSpec((tm, tn), lambda mi, ni: (mi, ni)),
        compiler_params=pltpu.CompilerParams(
            dimension_semantics=("parallel", "parallel")),
        cost_estimate=pl.CostEstimate(flops=flops, transcendentals=0,
                                      bytes_accessed=bytes_accessed),
    )
    return jax.jit(fn)


@functools.lru_cache(maxsize=None)
def _build_pool_call(t, mp, c, tm, tc, op):
    fn = pl.pallas_call(
        functools.partial(_pool_reduce_kernel, op=op, inv=1.0 / float(t)),
        out_shape=jax.ShapeDtypeStruct((mp, c), jnp.bfloat16),
        grid=(mp // tm, c // tc),
        in_specs=[pl.BlockSpec((t, tm, tc), lambda mi, ci: (0, mi, ci))],
        out_specs=pl.BlockSpec((tm, tc), lambda mi, ci: (mi, ci)),
        compiler_params=pltpu.CompilerParams(
            dimension_semantics=("parallel", "parallel")),
        cost_estimate=pl.CostEstimate(flops=t * mp * c, transcendentals=0,
                                      bytes_accessed=2 * (t + 1) * mp * c),
    )
    return jax.jit(fn)


@functools.lru_cache(maxsize=None)
def _build_gap_call(b, hwp, c, tc, hw):
    fn = pl.pallas_call(
        functools.partial(_gap_kernel, inv=1.0 / float(hw)),
        out_shape=jax.ShapeDtypeStruct((b, c), jnp.float32),
        grid=(c // tc,),
        in_specs=[pl.BlockSpec((b, hwp, tc), lambda ci: (0, 0, ci))],
        out_specs=pl.BlockSpec((b, tc), lambda ci: (0, ci)),
        compiler_params=pltpu.CompilerParams(dimension_semantics=("parallel",)),
        cost_estimate=pl.CostEstimate(flops=b * hwp * c, transcendentals=0,
                                      bytes_accessed=2 * b * hwp * c + 4 * b * c),
    )
    return jax.jit(fn)


# ----------------------------------------------------------------------------
# Conv wrapper (glue + pallas_call)
# ----------------------------------------------------------------------------
def _prepare_conv_params(w, scale, bias, stride, padding):
    """Pre-fold / pre-pad / pre-cast weights to kernel layout (done once at init)."""
    kh, kw, cin, cout = w.shape
    k_raw = kh * kw * cin
    kp = _round_up(k_raw, 16)
    n_pad = _round_up(cout, 128)
    wk = w.reshape(k_raw, cout)
    wk = jnp.pad(wk, ((0, kp - k_raw), (0, n_pad - cout))).astype(jnp.bfloat16)
    sp = jnp.zeros((1, n_pad), jnp.float32).at[0, :cout].set(scale)
    bp = jnp.zeros((1, n_pad), jnp.float32).at[0, :cout].set(bias)
    return dict(wk=wk, scale_p=sp, bias_p=bp, kh=kh, kw=kw, stride=stride,
                padding=padding, n=cout, n_pad=n_pad, k=k_raw, kp=kp, cin=cin)


def run_conv(x, p, relu=True):
    """y = relu(conv(x, w) * scale + bias) on NHWC bf16 input, returns NHWC bf16."""
    b, h, w_in, cin = x.shape
    kh, kw, stride = p["kh"], p["kw"], p["stride"]
    ph, pw = p["padding"]
    ho = (h + 2 * ph - kh) // stride + 1
    wo = (w_in + 2 * pw - kw) // stride + 1
    kp, n, n_pad = p["kp"], p["n"], p["n_pad"]

    x = x.astype(jnp.bfloat16)
    if kh == 1 and kw == 1 and stride == 1:
        xf = x.reshape(b * h * w_in, cin)
    else:
        # im2col: fold the (kh, kw) taps into K and the batch into M.
        xp = jnp.pad(x, ((0, 0), (ph, ph), (pw, pw), (0, 0))) if (ph or pw) else x
        cols = []
        for i in range(kh):
            for j in range(kw):
                cols.append(xp[:, i:i + stride * (ho - 1) + 1:stride,
                               j:j + stride * (wo - 1) + 1:stride, :])
        xf = jnp.concatenate(cols, axis=-1).reshape(b * ho * wo, kh * kw * cin)
    if kp > xf.shape[1]:
        xf = jnp.pad(xf, ((0, 0), (0, kp - xf.shape[1])))

    m = b * ho * wo
    tn = _pick_n_tile(n_pad)
    tm = _conv_m_tile(m, kp, tn)
    mp = _round_up(m, tm)
    if mp > m:
        xf = jnp.pad(xf, ((0, mp - m), (0, 0)))

    out = _build_conv_call(mp, kp, n_pad, tm, tn, relu)(
        xf, p["wk"], p["scale_p"], p["bias_p"])
    return out[:m, :n].reshape(b, ho, wo, n)


# ----------------------------------------------------------------------------
# Pooling wrappers
# ----------------------------------------------------------------------------
def _run_pool(x, kh, kw, stride, pad, op):
    b, h, w_in, c = x.shape
    ph, pw = pad
    ho = (h + 2 * ph - kh) // stride + 1
    wo = (w_in + 2 * pw - kw) // stride + 1
    x = x.astype(jnp.bfloat16)
    xp = jnp.pad(x, ((0, 0), (ph, ph), (pw, pw), (0, 0))) if (ph or pw) else x
    taps = []
    for i in range(kh):
        for j in range(kw):
            taps.append(xp[:, i:i + stride * (ho - 1) + 1:stride,
                           j:j + stride * (wo - 1) + 1:stride, :])
    t = len(taps)
    xt = jnp.stack(taps, axis=0).reshape(t, b * ho * wo, c)

    m = b * ho * wo
    tc = _pick_c_tile(c)
    tm = _pool_m_tile(m, t, tc)
    mp = _round_up(m, tm)
    if mp > m:
        xt = jnp.pad(xt, ((0, 0), (0, mp - m), (0, 0)))

    # count_include_pad=True (torch F.avg_pool2d default): divide by kh*kw always.
    out = _build_pool_call(t, mp, c, tm, tc, op)(xt)
    return out[:m].reshape(b, ho, wo, c)


def max_pool_3x3_s2(x):
    return _run_pool(x, 3, 3, 2, (0, 0), "max")


def avg_pool_3x3_s1_p1(x):
    return _run_pool(x, 3, 3, 1, (1, 1), "avg")


def global_avg_pool(x):
    """AdaptiveAvgPool2d((1,1)) + flatten on NHWC bf16 input -> [B, C] f32."""
    b, h, w_in, c = x.shape
    hw = h * w_in
    hwp = _round_up(hw, 16)
    xf = x.astype(jnp.bfloat16).reshape(b, hw, c)
    if hwp > hw:
        xf = jnp.pad(xf, ((0, 0), (0, hwp - hw), (0, 0)))
    tc = _pick_c_tile(c)
    return _build_gap_call(b, hwp, c, tc, hw)(xf)


# ----------------------------------------------------------------------------
# Modules (torchvision inception_v3 topology, deterministic random params)
# ----------------------------------------------------------------------------
class BasicConv2d:
    """Conv2d(bias=False) + BatchNorm2d(eps=1e-3, folded eval stats) + ReLU."""
    _counter = [0]

    def __init__(self, key, cin, cout, kernel_size, stride=1, padding=0):
        if isinstance(kernel_size, int):
            kernel_size = (kernel_size, kernel_size)
        if isinstance(padding, int):
            padding = (padding, padding)
        kh, kw = kernel_size
        kk = jax.random.fold_in(key, BasicConv2d._counter[0])
        BasicConv2d._counter[0] += 1
        kw_, kg, kb, km, kv = jax.random.split(kk, 5)
        fan_in = kh * kw * cin
        w = jax.random.normal(kw_, (kh, kw, cin, cout), jnp.float32) * jnp.sqrt(2.0 / fan_in)
        gamma = 1.0 + 0.1 * jax.random.normal(kg, (cout,), jnp.float32)
        beta = 0.1 * jax.random.normal(kb, (cout,), jnp.float32)
        mean = 0.1 * jax.random.normal(km, (cout,), jnp.float32)
        var = jax.random.uniform(kv, (cout,), jnp.float32, minval=0.5, maxval=1.5)
        eps = 1e-3
        scale = gamma / jnp.sqrt(var + eps)
        bias = beta - mean * scale
        self.cout = cout
        self.w_raw = w
        self.scale_raw = scale
        self.bias_raw = bias
        self.params = _prepare_conv_params(w, scale, bias, stride, padding)

    def __call__(self, x):
        return run_conv(x, self.params)


def _fuse_pointwise(convs):
    """Fuse parallel 1x1 convs (same input) into one matmul along Cout."""
    w = jnp.concatenate([c.w_raw for c in convs], axis=-1)
    s = jnp.concatenate([c.scale_raw for c in convs])
    bb = jnp.concatenate([c.bias_raw for c in convs])
    params = _prepare_conv_params(w, s, bb, 1, (0, 0))
    return params, [c.cout for c in convs]


def _run_fused_pointwise(x, fused):
    params, sizes = fused
    y = run_conv(x, params)
    outs, off = [], 0
    for sz in sizes:
        outs.append(y[..., off:off + sz])
        off += sz
    return outs


class InceptionA:
    def __init__(self, key, in_channels, pool_features):
        self.branch1x1 = BasicConv2d(key, in_channels, 64, 1)
        self.branch5x5_1 = BasicConv2d(key, in_channels, 48, 1)
        self.branch5x5_2 = BasicConv2d(key, 48, 64, 5, padding=2)
        self.branch3x3dbl_1 = BasicConv2d(key, in_channels, 64, 1)
        self.branch3x3dbl_2 = BasicConv2d(key, 64, 96, 3, padding=1)
        self.branch3x3dbl_3 = BasicConv2d(key, 96, 96, 3, padding=1)
        self.branch_pool = BasicConv2d(key, in_channels, pool_features, 1)
        self._stem = _fuse_pointwise(
            [self.branch1x1, self.branch5x5_1, self.branch3x3dbl_1])

    def __call__(self, x):
        b1, b5, b3 = _run_fused_pointwise(x, self._stem)
        b5 = self.branch5x5_2(b5)
        b3 = self.branch3x3dbl_3(self.branch3x3dbl_2(b3))
        bp = self.branch_pool(avg_pool_3x3_s1_p1(x))
        return jnp.concatenate([b1, b5, b3, bp], axis=-1)


class InceptionB:
    def __init__(self, key, in_channels):
        self.branch3x3 = BasicConv2d(key, in_channels, 384, 3, stride=2)
        self.branch3x3dbl_1 = BasicConv2d(key, in_channels, 64, 1)
        self.branch3x3dbl_2 = BasicConv2d(key, 64, 96, 3, padding=1)
        self.branch3x3dbl_3 = BasicConv2d(key, 96, 96, 3, stride=2)

    def __call__(self, x):
        b3 = self.branch3x3(x)
        b3d = self.branch3x3dbl_3(self.branch3x3dbl_2(self.branch3x3dbl_1(x)))
        bp = max_pool_3x3_s2(x)
        return jnp.concatenate([b3, b3d, bp], axis=-1)


class InceptionC:
    def __init__(self, key, in_channels, channels_7x7):
        c7 = channels_7x7
        self.branch1x1 = BasicConv2d(key, in_channels, 192, 1)
        self.branch7x7_1 = BasicConv2d(key, in_channels, c7, 1)
        self.branch7x7_2 = BasicConv2d(key, c7, c7, (1, 7), padding=(0, 3))
        self.branch7x7_3 = BasicConv2d(key, c7, 192, (7, 1), padding=(3, 0))
        self.branch7x7dbl_1 = BasicConv2d(key, in_channels, c7, 1)
        self.branch7x7dbl_2 = BasicConv2d(key, c7, c7, (7, 1), padding=(3, 0))
        self.branch7x7dbl_3 = BasicConv2d(key, c7, c7, (1, 7), padding=(0, 3))
        self.branch7x7dbl_4 = BasicConv2d(key, c7, c7, (7, 1), padding=(3, 0))
        self.branch7x7dbl_5 = BasicConv2d(key, c7, 192, (1, 7), padding=(0, 3))
        self.branch_pool = BasicConv2d(key, in_channels, 192, 1)
        self._stem = _fuse_pointwise(
            [self.branch1x1, self.branch7x7_1, self.branch7x7dbl_1])

    def __call__(self, x):
        b1, b7, b7d = _run_fused_pointwise(x, self._stem)
        b7 = self.branch7x7_3(self.branch7x7_2(b7))
        b7d = self.branch7x7dbl_5(self.branch7x7dbl_4(
            self.branch7x7dbl_3(self.branch7x7dbl_2(b7d))))
        bp = self.branch_pool(avg_pool_3x3_s1_p1(x))
        return jnp.concatenate([b1, b7, b7d, bp], axis=-1)


class InceptionD:
    def __init__(self, key, in_channels):
        self.branch3x3_1 = BasicConv2d(key, in_channels, 192, 1)
        self.branch3x3_2 = BasicConv2d(key, 192, 320, 3, stride=2)
        self.branch7x7x3_1 = BasicConv2d(key, in_channels, 192, 1)
        self.branch7x7x3_2 = BasicConv2d(key, 192, 192, (1, 7), padding=(0, 3))
        self.branch7x7x3_3 = BasicConv2d(key, 192, 192, (7, 1), padding=(3, 0))
        self.branch7x7x3_4 = BasicConv2d(key, 192, 192, 3, stride=2)
        self._stem = _fuse_pointwise([self.branch3x3_1, self.branch7x7x3_1])

    def __call__(self, x):
        b3s, b7s = _run_fused_pointwise(x, self._stem)
        b3 = self.branch3x3_2(b3s)
        b7 = self.branch7x7x3_4(self.branch7x7x3_3(self.branch7x7x3_2(b7s)))
        bp = max_pool_3x3_s2(x)
        return jnp.concatenate([b3, b7, bp], axis=-1)


class InceptionE:
    def __init__(self, key, in_channels):
        self.branch1x1 = BasicConv2d(key, in_channels, 320, 1)
        self.branch3x3_1 = BasicConv2d(key, in_channels, 384, 1)
        self.branch3x3_2a = BasicConv2d(key, 384, 384, (1, 3), padding=(0, 1))
        self.branch3x3_2b = BasicConv2d(key, 384, 384, (3, 1), padding=(1, 0))
        self.branch3x3dbl_1 = BasicConv2d(key, in_channels, 448, 1)
        self.branch3x3dbl_2 = BasicConv2d(key, 448, 384, 3, padding=1)
        self.branch3x3dbl_3a = BasicConv2d(key, 384, 384, (1, 3), padding=(0, 1))
        self.branch3x3dbl_3b = BasicConv2d(key, 384, 384, (3, 1), padding=(1, 0))
        self.branch_pool = BasicConv2d(key, in_channels, 192, 1)
        self._stem = _fuse_pointwise(
            [self.branch1x1, self.branch3x3_1, self.branch3x3dbl_1])

    def __call__(self, x):
        b1, b3s, b3ds = _run_fused_pointwise(x, self._stem)
        b3 = jnp.concatenate([self.branch3x3_2a(b3s), self.branch3x3_2b(b3s)], axis=-1)
        b3d = self.branch3x3dbl_2(b3ds)
        b3d = jnp.concatenate([self.branch3x3dbl_3a(b3d),
                               self.branch3x3dbl_3b(b3d)], axis=-1)
        bp = self.branch_pool(avg_pool_3x3_s1_p1(x))
        return jnp.concatenate([b1, b3, b3d, bp], axis=-1)


class InceptionFeatureExtractor:
    """inception_v3 with fc = Identity; forward returns [B, 2048] pooled features."""

    def __init__(self, key, transform_input=False):
        assert not transform_input  # matches the reference module's default
        self.Conv2d_1a_3x3 = BasicConv2d(key, 3, 32, 3, stride=2)
        self.Conv2d_2a_3x3 = BasicConv2d(key, 32, 32, 3)
        self.Conv2d_2b_3x3 = BasicConv2d(key, 32, 64, 3, padding=1)
        self.Conv2d_3b_1x1 = BasicConv2d(key, 64, 80, 1)
        self.Conv2d_4a_3x3 = BasicConv2d(key, 80, 192, 3)
        self.Mixed_5b = InceptionA(key, 192, 32)
        self.Mixed_5c = InceptionA(key, 256, 64)
        self.Mixed_5d = InceptionA(key, 288, 64)
        self.Mixed_6a = InceptionB(key, 288)
        self.Mixed_6b = InceptionC(key, 768, 128)
        self.Mixed_6c = InceptionC(key, 768, 160)
        self.Mixed_6d = InceptionC(key, 768, 160)
        self.Mixed_6e = InceptionC(key, 768, 192)
        self.Mixed_7a = InceptionD(key, 768)
        self.Mixed_7b = InceptionE(key, 1280)
        self.Mixed_7c = InceptionE(key, 2048)

    def __call__(self, x_nchw):
        # NCHW -> NHWC, cast once to bf16 (all kernels keep activations bf16).
        x = jnp.transpose(x_nchw, (0, 2, 3, 1)).astype(jnp.bfloat16)
        x = self.Conv2d_1a_3x3(x)
        x = self.Conv2d_2a_3x3(x)
        x = self.Conv2d_2b_3x3(x)
        x = max_pool_3x3_s2(x)
        x = self.Conv2d_3b_1x1(x)
        x = self.Conv2d_4a_3x3(x)
        x = max_pool_3x3_s2(x)
        x = self.Mixed_5b(x)
        x = self.Mixed_5c(x)
        x = self.Mixed_5d(x)
        x = self.Mixed_6a(x)
        x = self.Mixed_6b(x)
        x = self.Mixed_6c(x)
        x = self.Mixed_6d(x)
        x = self.Mixed_6e(x)
        x = self.Mixed_7a(x)
        x = self.Mixed_7b(x)
        x = self.Mixed_7c(x)
        x = global_avg_pool(x)        # AdaptiveAvgPool2d((1,1)) + flatten -> f32
        # dropout: identity (eval); model.fc: nn.Identity
        return x                       # [B, 2048] f32


if __name__ == "__main__":
    key = jax.random.PRNGKey(0)
    pkey, xkey = jax.random.split(key)
    model = InceptionFeatureExtractor(pkey)
    # smallest valid Inception-v3 input: 3 channels, 75x75 spatial; batch = 2
    x = jax.random.normal(xkey, (2, 3, 75, 75), jnp.float32)
    feats = jax.block_until_ready(model(x))
    assert feats.shape == (2, 2048) and feats.dtype == jnp.float32
    assert bool(jnp.all(jnp.isfinite(feats)))
    print("KERNEL_OK")
</pallas_src>

<mosaic_0001>
module attributes {stable_mosaic.version = 11 : i64} {
  func.func @_matmul_bn_kernel(%arg0: i32, %arg1: i32, %arg2: memref<1376x32xbf16, #tpu.memory_space<vmem>>, %arg3: memref<32x128xbf16, #tpu.memory_space<vmem>>, %arg4: memref<1x128xf32, #tpu.memory_space<vmem>>, %arg5: memref<1x128xf32, #tpu.memory_space<vmem>>, %arg6: memref<1376x128xbf16, #tpu.memory_space<vmem>>) attributes {dimension_semantics = [#tpu.dimension_semantics<parallel>, #tpu.dimension_semantics<parallel>], iteration_bounds = array<i64: 2, 1>, scalar_prefetch = 0 : i64, scratch_operands = 0 : i64, tpu.core_type = #tpu.core_type<tc>, window_params = [{transform_indices = @transform_0, window_bounds = array<i64: 1376, 32>}, {transform_indices = @transform_1, window_bounds = array<i64: 32, 128>}, {transform_indices = @transform_2, window_bounds = array<i64: 1, 128>}, {transform_indices = @transform_3, window_bounds = array<i64: 1, 128>}, {transform_indices = @transform_4, window_bounds = array<i64: 1376, 128>}]} {
    %c0 = arith.constant 0 : index
    %c0_0 = arith.constant 0 : index
    %0 = vector.load %arg2[%c0, %c0_0] : memref<1376x32xbf16, #tpu.memory_space<vmem>>, vector<1376x32xbf16>
    %c0_1 = arith.constant 0 : index
    %c0_2 = arith.constant 0 : index
    %1 = vector.load %arg3[%c0_1, %c0_2] : memref<32x128xbf16, #tpu.memory_space<vmem>>, vector<32x128xbf16>
    %cst = arith.constant dense<0.000000e+00> : vector<1376x128xf32>
    %2 = tpu.matmul %0, %1, %cst {dimension_numbers = #tpu.dot_dimension_numbers<[1], [0], [0], [1], [0, 0, 1, 1], [], []>} : vector<1376x32xbf16>, vector<32x128xbf16>, vector<1376x128xf32> -> vector<1376x128xf32>
    %c0_3 = arith.constant 0 : index
    %c0_4 = arith.constant 0 : index
    %3 = vector.load %arg4[%c0_3, %c0_4] : memref<1x128xf32, #tpu.memory_space<vmem>>, vector<1x128xf32>
    %4 = vector.broadcast %3 : vector<1x128xf32> to vector<1376x128xf32>
    %5 = arith.mulf %2, %4 : vector<1376x128xf32>
    %c0_5 = arith.constant 0 : index
    %c0_6 = arith.constant 0 : index
    %6 = vector.load %arg5[%c0_5, %c0_6] : memref<1x128xf32, #tpu.memory_space<vmem>>, vector<1x128xf32>
    %7 = vector.broadcast %6 : vector<1x128xf32> to vector<1376x128xf32>
    %8 = arith.addf %5, %7 : vector<1376x128xf32>
    %cst_7 = arith.constant 0.000000e+00 : f32
    %9 = vector.broadcast %cst_7 : f32 to vector<1376x128xf32>
    %10 = arith.maximumf %8, %9 : vector<1376x128xf32>
    %11 = arith.truncf %10 : vector<1376x128xf32> to vector<1376x128xbf16>
    %c0_8 = arith.constant 0 : index
    %c0_9 = arith.constant 0 : index
    %12 = vector.load %arg6[%c0_8, %c0_9] : memref<1376x128xbf16, #tpu.memory_space<vmem>>, vector<1376x128xbf16>
    tpu.vector_store %arg6[%c0_8, %c0_9], %11 {strides = array<i32>} : memref<1376x128xbf16, #tpu.memory_space<vmem>>, vector<1376x128xbf16>,
    return
  }
  func.func @transform_0(%arg0: i32, %arg1: i32) -> (i32, i32) {
    %c0_i32 = arith.constant 0 : i32
    %c0_i32_0 = arith.constant 0 : i32
    return %arg0, %c0_i32 : i32, i32
  }
  func.func @transform_1(%arg0: i32, %arg1: i32) -> (i32, i32) {
    %c0_i32 = arith.constant 0 : i32
    %c0_i32_0 = arith.constant 0 : i32
    return %c0_i32, %arg1 : i32, i32
  }
  func.func @transform_2(%arg0: i32, %arg1: i32) -> (i32, i32) {
    %c0_i32 = arith.constant 0 : i32
    %c0_i32_0 = arith.constant 0 : i32
    return %c0_i32, %arg1 : i32, i32
  }
  func.func @transform_3(%arg0: i32, %arg1: i32) -> (i32, i32) {
    %c0_i32 = arith.constant 0 : i32
    %c0_i32_0 = arith.constant 0 : i32
    return %c0_i32, %arg1 : i32, i32
  }
  func.func @transform_4(%arg0: i32, %arg1: i32) -> (i32, i32) {
    %c0_i32 = arith.constant 0 : i32
    return %arg0, %arg1 : i32, i32
  }
}

</mosaic_0001>

<bundles_post_ra>
// kernel: tpu_custom_call.1
= control target key start
LH: loop header
LB: loop body
LE: loop exit
PB: predicated region body
PF: predicated region fallthrough
CT: control target
= control target key end

     0   :  { %9 = vsyncpa [#allocation3], 0  ;;  %s5696_s0 = inlined_call_operand.vmem [shape: bf16[2752,32], index: 0, kind: input, shape index: {}]   ;;  %s5697_s1 = inlined_call_operand.vmem [shape: bf16[32,128], index: 1, kind: input, shape index: {}]   ;;  %s5698_s2 = inlined_call_operand.vmem [shape: f32[1,128], index: 2, kind: input, shape index: {}]   ;;  %s5699_s3 = inlined_call_operand.vmem [shape: f32[1,128], index: 3, kind: input, shape index: {}]   ;;  %s5700_s4 = inlined_call_operand.hbm [shape: bf16[2752,128], index: 4, kind: output, shape index: {}]  }
   0x1   :  { %11 = vsyncpa [#allocation3 + $0x1], 0  ;;  %s4945_s15 = smov 0   ;;  %s4947_s16 = smov 0  }
   0x2   :  { %s4949_s17 = smov 0   ;;  %s4951_s18 = smov 0  }
   0x3   :  { %s4953_s19 = smov 0   ;;  %s4955_s20 = smov 0  }
   0x4 LB: > { %s3373_s21 = sadd.s32 4294967295, %s4915_s20   ;;  %s3374_s22 = sadd.s32 4294967294, %s4915_s20   ;;  %s4915_s20 = sphi %s4955_s20, %s17_s20   ;;  %s4911_s19 = sphi %s4953_s19, %s5707_s19   ;;  %s4907_s18 = sphi %s4951_s18, %s5706_s18   ;;  %s4903_s17 = sphi %s4949_s17, %s5705_s17   ;;  %s4899_s16 = sphi %s4947_s16, %s5704_s16   ;;  %s4895_s15 = sphi %s4945_s15, %s5703_s15  }
   0x5   : > { %s29_s23 = sadd.s32 1, %s4911_s19  ;;  %s142_s24 = sadd.s32 1, %s4903_s17 }
   0x6   : > { %p31_p0 = scmp.ge.s32.totalorder %s29_s23, 2  ;;  %p152_p1 = scmp.ne.s32.totalorder %s4903_s17, %s4899_s16 }
   0x7   : > { %p153_p2 = scmp.eq.s32.totalorder %s3373_s21, 1  ;;  %p158_p3 = scmp.ne.s32.totalorder %s4899_s16, %s4895_s15 }
   0x8   : > { %s5709_s23 = smov (%p31_p0, %s29_s23), 0  ;;  %p159_p5 = scmp.eq.s32.totalorder %s3374_s22, 1 }
   0x9   : > { %p4985_p4 = por %p153_p2, %p152_p1  ;;  %s137_s26 = ssub.s32 %s4911_s19, %s5709_s23 }
   0xa   : > { %p3380_p6 = scmp.ge.s32.totalorder %s4915_s20, 1  ;;  %p140_p7 = scmp.eq.s32.totalorder %s137_s26, 0 }
   0xb   : > { %p4992_p8 = por %p159_p5, %p158_p3  ;;  %p205_p9 = scmp.lt.s32.totalorder %s4915_s20, 3 }
   0xc   : > { %s4998_s28 = scalar_select %p140_p7, %s4903_s17, %s142_s24  }
   0xd   : > { %p206_p10 = pnand %p3380_p6, %p205_p9 }
   0xe   : > { %v4747_v0 = vld [vmem:[%s5697_s1] sm:$0xff] (!%p206_p10)   ;;  %s241_s5 = smul.u32 (!%p206_p10), 172, %s4907_s18  ;;  %v4748_v1 = vld [vmem:[%s5697_s1 + $0x8] sm:$0xff] (!%p206_p10)   ;;  %vm877_vm0 = vcmask (!%p206_p10), 261120   ;;  %s238_s22 = sand.u32 (!%p206_p10), 1, %s4899_s16  }
   0xf   : > { %209 = sbr.rel (%p206_p10) target bundleno = 433 (0x1b1), region = 36  ;;  %4509 = vmatprep.subr.bf16.mxu0 (!%p206_p10), %v4747_v0  ;;  %4685 = vmatprep.subr.bf16.mxu1 (!%p206_p10), %v4747_v0  ;;  %s4917_s13 = smov (!%p206_p10), [#allocation2]  }
  0x10   : > { %p242_p11 = scmp.lt.s32.totalorder (!%p206_p10), %s241_s5, 343  ;;  %4510 = vmatpush3.bf16.msra.mxu0 (!%p206_p10), %v4747_v0  ;;  %4687 = vmatpush3.bf16.msra.mxu1 (!%p206_p10), %v4747_v0  ;;  %s4689_s24 = smul.u32 (!%p206_p10), 688, %s238_s22 }
  0x11   : > { %4511 = vmatprep.subr.bf16.mxu0 (!%p206_p10), %v4748_v1  ;;  %4686 = vmatprep.subr.bf16.mxu1 (!%p206_p10), %v4748_v1  ;;  %s3905_s7 = smul.u32 (!%p206_p10), 11008, %s4907_s18  ;;  %s5650_s18 = scalar_lea.sflag (!%p206_p10), [#allocation3], %s238_s22 }
  0x12   : > { %s5215_s26 = scalar_lea.vmem (!%p206_p10), [#allocation2], %s4689_s24  ;;  %s4841_s14 = sshll.u32 (!%p206_p10), %s4917_s13, 4  ;;  %s4842_s14 = int_to_ptr.vmem [resolvable:$false] %s4841_s14 }
  0x13   : > { %s4843_s21 = scalar_lea.vmem (!%p206_p10), %s4842_s14, 22016 }
  0x14   : > { %4512 = vmatpush3.bf16.msra.mxu0 (!%p206_p10), %v4748_v1  ;;  %4688 = vmatpush3.bf16.msra.mxu1 (!%p206_p10), %v4748_v1 }
  0x16   : > { %s5711_s5 = smov (!%p242_p11, %s241_s5), 343 }
  0x17   : > { %s3381_s8 = sshll.u32 %s5711_s5, 2 }
  0x18   : > { %s5010_s11 = scalar_lea.vmem %s5696_s0, %s3381_s8  ;;  %s3262_s8 = sshll.u32 %s5215_s26, 4  ;;  %s5644_s8 = int_to_ptr.vmem [resolvable:$true] %s3262_s8 }
  0x19   : > { %v4749_v2 = vld [vmem:[%s5010_s11] sm:$0xff]   ;;  %v4750_v3 = vld [vmem:[%s5010_s11 + $0x8] sm:$0xff]   ;;  %v4753_v6 = vld [vmem:[%s5010_s11 + $0x10] sm:$0xff]   ;;  %s4837_s12 = scalar_lea.vmem %s5644_s8, 11008  ;;  %p4844_p1 = scmp.lt.s32.totalorder %s5644_s8, %s4842_s14 }
  0x1a   : > { %4513 = vmatprep.mubr.msk.bf16.mxu0 %vm877_vm0, %v4749_v2  ;;  %v4751_v4 = vld [vmem:[%s5010_s11 + $0x160] sm:$0xff]   ;;  %v4752_v5 = vld [vmem:[%s5010_s11 + $0x168] sm:$0xff]   ;;  %v4755_v7 = vld [vmem:[%s5010_s11 + $0x170] sm:$0xff]   ;;  %p4838_p12 = scmp.ne.s32.totalorder %s5644_s8, %s4837_s12  ;;  %p4845_p2 = scmp.lt.s32.totalorder %s4843_s21, %s4837_s12 }
  0x1b   : > { %4514 = vmatmul.mubr.msk.bf16.vlgmr.msra.gmra.mrb[0].mxu0 %vm877_vm0, %v4750_v3  ;;  %4601 = vmatprep.mubr.msk.bf16.mxu1 %vm877_vm0, %v4751_v4  ;;  %v4754_v8 = vld [vmem:[%s5010_s11 + $0x18] sm:$0xff]   ;;  %v4757_v9 = vld [vmem:[%s5010_s11 + $0x20] sm:$0xff]   ;;  %v4758_v12 = vld [vmem:[%s5010_s11 + $0x28] sm:$0xff]  }
  0x1c   : > { %4602 = vmatmul.mubr.msk.bf16.vlgmr.msra.gmra.mrb[0].mxu1 %vm877_vm0, %v4752_v5  ;;  %4517 = vmatprep.mubr.msk.bf16.mxu0 %vm877_vm0, %v4753_v6  ;;  %v4756_v10 = vld [vmem:[%s5010_s11 + $0x178] sm:$0xff]   ;;  %v4759_v11 = vld [vmem:[%s5010_s11 + $0x180] sm:$0xff]   ;;  %v4761_v13 = vld [vmem:[%s5010_s11 + $0x30] sm:$0xff]   ;;  %p4839_p13 = pnand %p4838_p12, %p4985_p4  ;;  %p4846_p3 = por %p4845_p2, %p4844_p1 }
  0x1d   : > { %4605 = vmatprep.mubr.msk.bf16.mxu1 %vm877_vm0, %v4755_v7  ;;  %v4760_v14 = vld [vmem:[%s5010_s11 + $0x188] sm:$0xff]   ;;  %v4763_v15 = vld [vmem:[%s5010_s11 + $0x190] sm:$0xff]   ;;  %v4762_v16 = vld [vmem:[%s5010_s11 + $0x38] sm:$0xff]  }
  0x1e   : > { %v4765_v17 = vld [vmem:[%s5010_s11 + $0x40] sm:$0xff]   ;;  %v4764_v18 = vld [vmem:[%s5010_s11 + $0x198] sm:$0xff]   ;;  %v4766_v20 = vld [vmem:[%s5010_s11 + $0x48] sm:$0xff]   ;;  %p4840_p0 = pneg %p4839_p13 }
  0x1f   : > { %v4767_v19 = vld [vmem:[%s5010_s11 + $0x1a0] sm:$0xff]   ;;  %v4769_v21 = vld [vmem:[%s5010_s11 + $0x50] sm:$0xff]   ;;  %v4768_v22 = vld [vmem:[%s5010_s11 + $0x1a8] sm:$0xff]  }
  0x20   : > { %v4771_v23 = vld [vmem:[%s5010_s11 + $0x1b0] sm:$0xff]   ;;  %v4770_v24 = vld [vmem:[%s5010_s11 + $0x58] sm:$0xff]   ;;  %v4773_v25 = vld [vmem:[%s5010_s11 + $0x60] sm:$0xff]   ;;  %p4847_p5 = pnand %p4846_p3, %p4840_p0 }
  0x21   : > { %v4772_v26 = vld [vmem:[%s5010_s11 + $0x1b8] sm:$0xff]   ;;  %v4775_v27 = vld [vmem:[%s5010_s11 + $0x1c0] sm:$0xff]   ;;  %v4774_v28 = vld [vmem:[%s5010_s11 + $0x68] sm:$0xff]  }
  0x22   : > { %v4777_v29 = vld [vmem:[%s5010_s11 + $0x70] sm:$0xff]   ;;  %v4776_v30 = vld [vmem:[%s5010_s11 + $0x1c8] sm:$0xff]   ;;  %v4778_v32 = vld [vmem:[%s5010_s11 + $0x78] sm:$0xff]  }
  0x23   : > { %4518 = vmatmul.mubr.msk.bf16.gmra.mrb[4].mxu0 %vm877_vm0, %v4754_v8  ;;  %v4779_v31 = vld [vmem:[%s5010_s11 + $0x1d0] sm:$0xff]   ;;  %v4781_v33 = vld [vmem:[%s5010_s11 + $0x80] sm:$0xff]   ;;  %v4780_v34 = vld [vmem:[%s5010_s11 + $0x1d8] sm:$0xff]  }
  0x24   : > { %4521 = vmatprep.mubr.msk.bf16.mxu0 %vm877_vm0, %v4757_v9  ;;  %4606 = vmatmul.mubr.msk.bf16.gmra.mrb[4].mxu1 %vm877_vm0, %v4756_v10  ;;  %v4783_v35 = vld [vmem:[%s5010_s11 + $0x1e0] sm:$0xff]   ;;  %v4782_v36 = vld [vmem:[%s5010_s11 + $0x88] sm:$0xff]   ;;  %v4785_v37 = vld [vmem:[%s5010_s11 + $0x90] sm:$0xff]  }
  0x25   : > { %4609 = vmatprep.mubr.msk.bf16.mxu1 %vm877_vm0, %v4759_v11  ;;  %v4784_v38 = vld [vmem:[%s5010_s11 + $0x1e8] sm:$0xff]   ;;  %v4787_v39 = vld [vmem:[%s5010_s11 + $0x1f0] sm:$0xff]   ;;  %v4786_v40 = vld [vmem:[%s5010_s11 + $0x98] sm:$0xff]  }
  0x26   : > { %v4789_v41 = vld [vmem:[%s5010_s11 + $0xa0] sm:$0xff]   ;;  %v4788_v42 = vld [vmem:[%s5010_s11 + $0x1f8] sm:$0xff]   ;;  %v4790_v44 = vld [vmem:[%s5010_s11 + $0xa8] sm:$0xff]  }
  0x27   : > { %v4791_v43 = vld [vmem:[%s5010_s11 + $0x200] sm:$0xff]   ;;  %v4793_v45 = vld [vmem:[%s5010_s11 + $0xb0] sm:$0xff]   ;;  %v4792_v46 = vld [vmem:[%s5010_s11 + $0x208] sm:$0xff]  }
  0x28   : > { %v4795_v47 = vld [vmem:[%s5010_s11 + $0x210] sm:$0xff]   ;;  %v4794_v48 = vld [vmem:[%s5010_s11 + $0xb8] sm:$0xff]   ;;  %v4797_v49 = vld [vmem:[%s5010_s11 + $0xc0] sm:$0xff]  }
  0x29   : > { %v4796_v50 = vld [vmem:[%s5010_s11 + $0x218] sm:$0xff]   ;;  %v4799_v51 = vld [vmem:[%s5010_s11 + $0x220] sm:$0xff]   ;;  %v4798_v52 = vld [vmem:[%s5010_s11 + $0xc8] sm:$0xff]  }
  0x2a   : > { %v4801_v53 = vld [vmem:[%s5010_s11 + $0xd0] sm:$0xff]   ;;  %v4800_v54 = vld [vmem:[%s5010_s11 + $0x228] sm:$0xff]   ;;  %v4802_v56 = vld [vmem:[%s5010_s11 + $0xd8] sm:$0xff]  }
  0x2b   : > { %4522 = vmatmul.mubr.msk.bf16.gmra.mrb[8].mxu0 %vm877_vm0, %v4758_v12  ;;  %v4803_v55 = vld [vmem:[%s5010_s11 + $0x230] sm:$0xff]   ;;  %v4805_v57 = vld [vmem:[%s5010_s11 + $0xe0] sm:$0xff]   ;;  %v4804_v58 = vld [vmem:[%s5010_s11 + $0x238] sm:$0xff]  }
  0x2c   : > { %4525 = vmatprep.mubr.msk.bf16.mxu0 %vm877_vm0, %v4761_v13  ;;  %4610 = vmatmul.mubr.msk.bf16.gmra.mrb[8].mxu1 %vm877_vm0, %v4760_v14  ;;  %v4807_v59 = vld [vmem:[%s5010_s11 + $0x240] sm:$0xff]   ;;  %v4806_v60 = vld [vmem:[%s5010_s11 + $0xe8] sm:$0xff]   ;;  %v4809_v61 = vld [vmem:[%s5010_s11 + $0xf0] sm:$0xff]  }
  0x2d   : > { %4613 = vmatprep.mubr.msk.bf16.mxu1 %vm877_vm0, %v4763_v15  ;;  %v4808_v62 = vld [vmem:[%s5010_s11 + $0x248] sm:$0xff]   ;;  %v4811_v63 = vld [vmem:[%s5010_s11 + $0x250] sm:$0xff]   ;;  %v4810_v0 = vld [vmem:[%s5010_s11 + $0xf8] sm:$0xff]  }
  0x2e   : > { %v4813_v1 = vld [vmem:[%s5010_s11 + $0x100] sm:$0xff]   ;;  %v4812_v2 = vld [vmem:[%s5010_s11 + $0x258] sm:$0xff]   ;;  %v4814_v4 = vld [vmem:[%s5010_s11 + $0x108] sm:$0xff]  }
  0x2f   : > { %v4815_v3 = vld [vmem:[%s5010_s11 + $0x260] sm:$0xff]   ;;  %v4817_v5 = vld [vmem:[%s5010_s11 + $0x110] sm:$0xff]   ;;  %v4816_v6 = vld [vmem:[%s5010_s11 + $0x268] sm:$0xff]  }
  0x30   : > { %v4819_v7 = vld [vmem:[%s5010_s11 + $0x270] sm:$0xff]   ;;  %v4818_v8 = vld [vmem:[%s5010_s11 + $0x118] sm:$0xff]   ;;  %v4821_v9 = vld [vmem:[%s5010_s11 + $0x120] sm:$0xff]  }
  0x31   : > { %v4820_v10 = vld [vmem:[%s5010_s11 + $0x278] sm:$0xff]   ;;  %v4823_v11 = vld [vmem:[%s5010_s11 + $0x280] sm:$0xff]   ;;  %v4822_v12 = vld [vmem:[%s5010_s11 + $0x128] sm:$0xff]  }
  0x32   : > { %v4825_v13 = vld [vmem:[%s5010_s11 + $0x130] sm:$0xff]   ;;  %v4824_v14 = vld [vmem:[%s5010_s11 + $0x288] sm:$0xff]  }
  0x33   : > { %4526 = vmatmul.mubr.msk.bf16.gmra.mrb[12].mxu0 %vm877_vm0, %v4762_v16  ;;  %v4827_v15 = vld [vmem:[%s5010_s11 + $0x290] sm:$0xff]   ;;  %v4826_v16 = vld [vmem:[%s5010_s11 + $0x138] sm:$0xff]  }
  0x34   : > { %4529 = vmatprep.mubr.msk.bf16.mxu0 %vm877_vm0, %v4765_v17  ;;  %4614 = vmatmul.mubr.msk.bf16.gmra.mrb[12].mxu1 %vm877_vm0, %v4764_v18  ;;  %v4829_v17 = vld [vmem:[%s5010_s11 + $0x140] sm:$0xff]   ;;  %v4828_v18 = vld [vmem:[%s5010_s11 + $0x298] sm:$0xff]  }
  0x35   : > { %4617 = vmatprep.mubr.msk.bf16.mxu1 %vm877_vm0, %v4767_v19  ;;  %v4831_v19 = vld [vmem:[%s5010_s11 + $0x2a0] sm:$0xff]  }
  0x3b   : > { %4530 = vmatmul.mubr.msk.bf16.gmra.mrb[16].mxu0 %vm877_vm0, %v4766_v20  ;;  %v4830_v20 = vld [vmem:[%s5010_s11 + $0x148] sm:$0xff]  }
  0x3c   : > { %4533 = vmatprep.mubr.msk.bf16.mxu0 %vm877_vm0, %v4769_v21  ;;  %4618 = vmatmul.mubr.msk.bf16.gmra.mrb[16].mxu1 %vm877_vm0, %v4768_v22  ;;  %v4833_v21 = vld [vmem:[%s5010_s11 + $0x150] sm:$0xff]   ;;  %v4832_v22 = vld [vmem:[%s5010_s11 + $0x2a8] sm:$0xff]  }
  0x3d   : > { %4621 = vmatprep.mubr.msk.bf16.mxu1 %vm877_vm0, %v4771_v23  ;;  %v4834_v23 = vld [vmem:[%s5010_s11 + $0x158] sm:$0xff]   ;;  %s5642_s11 = scalar_lea.hbm %s5700_s4, %s3905_s7 }
  0x43   : > { %4534 = vmatmul.mubr.msk.bf16.gmra.mrb[20].mxu0 %vm877_vm0, %v4770_v24  ;;  %v5187_v24 = vld [vmem:[%s5698_s2] ss:$0 sm:$0xff] }
  0x44   : > { %4537 = vmatprep.mubr.msk.bf16.mxu0 %vm877_vm0, %v4773_v25  ;;  %4622 = vmatmul.mubr.msk.bf16.gmra.mrb[20].mxu1 %vm877_vm0, %v4772_v26  ;;  %v5192_v26 = vld [vmem:[%s5699_s3] ss:$0 sm:$0xff] }
  0x45   : > { %4625 = vmatprep.mubr.msk.bf16.mxu1 %vm877_vm0, %v4775_v27 }
  0x4b   : > { %4538 = vmatmul.mubr.msk.bf16.gmra.mrb[24].mxu0 %vm877_vm0, %v4774_v28 }
  0x4c   : > { %4541 = vmatprep.mubr.msk.bf16.mxu0 %vm877_vm0, %v4777_v29  ;;  %4626 = vmatmul.mubr.msk.bf16.gmra.mrb[24].mxu1 %vm877_vm0, %v4776_v30 }
  0x4d   : > { %4629 = vmatprep.mubr.msk.bf16.mxu1 %vm877_vm0, %v4779_v31 }
  0x53   : > { %4542 = vmatmul.mubr.msk.bf16.gmra.mrb[28].mxu0 %vm877_vm0, %v4778_v32 }
  0x54   : > { %4545 = vmatprep.mubr.msk.bf16.mxu0 %vm877_vm0, %v4781_v33  ;;  %4630 = vmatmul.mubr.msk.bf16.gmra.mrb[28].mxu1 %vm877_vm0, %v4780_v34 }
  0x55   : > { %4633 = vmatprep.mubr.msk.bf16.mxu1 %vm877_vm0, %v4783_v35 }
  0x5b   : > { %4546 = vmatmul.mubr.msk.bf16.gmra.mrb[32].mxu0 %vm877_vm0, %v4782_v36 }
  0x5c   : > { %4549 = vmatprep.mubr.msk.bf16.mxu0 %vm877_vm0, %v4785_v37  ;;  %4634 = vmatmul.mubr.msk.bf16.gmra.mrb[32].mxu1 %vm877_vm0, %v4784_v38 }
  0x5d   : > { %4637 = vmatprep.mubr.msk.bf16.mxu1 %vm877_vm0, %v4787_v39 }
  0x63   : > { %4550 = vmatmul.mubr.msk.bf16.gmra.mrb[36].mxu0 %vm877_vm0, %v4786_v40 }
  0x64   : > { %4553 = vmatprep.mubr.msk.bf16.mxu0 %vm877_vm0, %v4789_v41  ;;  %4638 = vmatmul.mubr.msk.bf16.gmra.mrb[36].mxu1 %vm877_vm0, %v4788_v42 }
  0x65   : > { %4641 = vmatprep.mubr.msk.bf16.mxu1 %vm877_vm0, %v4791_v43 }
  0x6b   : > { %4554 = vmatmul.mubr.msk.bf16.gmra.mrb[40].mxu0 %vm877_vm0, %v4790_v44 }
  0x6c   : > { %4557 = vmatprep.mubr.msk.bf16.mxu0 %vm877_vm0, %v4793_v45  ;;  %4642 = vmatmul.mubr.msk.bf16.gmra.mrb[40].mxu1 %vm877_vm0, %v4792_v46 }
  0x6d   : > { %4645 = vmatprep.mubr.msk.bf16.mxu1 %vm877_vm0, %v4795_v47 }
  0x73   : > { %4558 = vmatmul.mubr.msk.bf16.gmra.mrb[44].mxu0 %vm877_vm0, %v4794_v48 }
  0x74   : > { %4561 = vmatprep.mubr.msk.bf16.mxu0 %vm877_vm0, %v4797_v49  ;;  %4646 = vmatmul.mubr.msk.bf16.gmra.mrb[44].mxu1 %vm877_vm0, %v4796_v50 }
  0x75   : > { %4649 = vmatprep.mubr.msk.bf16.mxu1 %vm877_vm0, %v4799_v51 }
  0x7b   : > { %4562 = vmatmul.mubr.msk.bf16.gmra.mrb[48].mxu0 %vm877_vm0, %v4798_v52 }
  0x7c   : > { %4565 = vmatprep.mubr.msk.bf16.mxu0 %vm877_vm0, %v4801_v53  ;;  %4650 = vmatmul.mubr.msk.bf16.gmra.mrb[48].mxu1 %vm877_vm0, %v4800_v54 }
  0x7d   : > { %4653 = vmatprep.mubr.msk.bf16.mxu1 %vm877_vm0, %v4803_v55 }
  0x83   : > { %4566 = vmatmul.mubr.msk.bf16.gmra.mrb[52].mxu0 %vm877_vm0, %v4802_v56 }
  0x84   : > { %4569 = vmatprep.mubr.msk.bf16.mxu0 %vm877_vm0, %v4805_v57  ;;  %4654 = vmatmul.mubr.msk.bf16.gmra.mrb[52].mxu1 %vm877_vm0, %v4804_v58 }
  0x85   : > { %4657 = vmatprep.mubr.msk.bf16.mxu1 %vm877_vm0, %v4807_v59 }
  0x8b   : > { %4570 = vmatmul.mubr.msk.bf16.gmra.mrb[56].mxu0 %vm877_vm0, %v4806_v60 }
  0x8c   : > { %4573 = vmatprep.mubr.msk.bf16.mxu0 %vm877_vm0, %v4809_v61  ;;  %4658 = vmatmul.mubr.msk.bf16.gmra.mrb[56].mxu1 %vm877_vm0, %v4808_v62 }
  0x8d   : > { %4661 = vmatprep.mubr.msk.bf16.mxu1 %vm877_vm0, %v4811_v63 }
  0x93   : > { %4574 = vmatmul.mubr.msk.bf16.gmra.mrb[60].mxu0 %vm877_vm0, %v4810_v0 }
  0x94   : > { %4577 = vmatprep.mubr.msk.bf16.mxu0 %vm877_vm0, %v4813_v1  ;;  %4662 = vmatmul.mubr.msk.bf16.gmra.mrb[60].mxu1 %vm877_vm0, %v4812_v2 }
  0x95   : > { %4665 = vmatprep.mubr.msk.bf16.mxu1 %vm877_vm0, %v4815_v3 }
  0x9b   : > { %4578 = vmatmul.mubr.msk.bf16.gmra.mrb[64].mxu0 %vm877_vm0, %v4814_v4 }
  0x9c   : > { %4581 = vmatprep.mubr.msk.bf16.mxu0 %vm877_vm0, %v4817_v5  ;;  %4666 = vmatmul.mubr.msk.bf16.gmra.mrb[64].mxu1 %vm877_vm0, %v4816_v6 }
  0x9d   : > { %4669 = vmatprep.mubr.msk.bf16.mxu1 %vm877_vm0, %v4819_v7 }
  0xa3   : > { %4582 = vmatmul.mubr.msk.bf16.gmra.mrb[68].mxu0 %vm877_vm0, %v4818_v8 }
  0xa4   : > { %4585 = vmatprep.mubr.msk.bf16.mxu0 %vm877_vm0, %v4821_v9  ;;  %4670 = vmatmul.mubr.msk.bf16.gmra.mrb[68].mxu1 %vm877_vm0, %v4820_v10 }
  0xa5   : > { %4673 = vmatprep.mubr.msk.bf16.mxu1 %vm877_vm0, %v4823_v11 }
  0xab   : > { %4586 = vmatmul.mubr.msk.bf16.gmra.mrb[72].mxu0 %vm877_vm0, %v4822_v12 }
  0xac   : > { %4589 = vmatprep.mubr.msk.bf16.mxu0 %vm877_vm0, %v4825_v13  ;;  %4674 = vmatmul.mubr.msk.bf16.gmra.mrb[72].mxu1 %vm877_vm0, %v4824_v14 }
  0xad   : > { %4677 = vmatprep.mubr.msk.bf16.mxu1 %vm877_vm0, %v4827_v15 }
  0xb3   : > { %4590 = vmatmul.mubr.msk.bf16.gmra.mrb[76].mxu0 %vm877_vm0, %v4826_v16 }
  0xb4   : > { %4593 = vmatprep.mubr.msk.bf16.mxu0 %vm877_vm0, %v4829_v17  ;;  %4678 = vmatmul.mubr.msk.bf16.gmra.mrb[76].mxu1 %vm877_vm0, %v4828_v18 }
  0xb5   : > { %4681 = vmatprep.mubr.msk.bf16.mxu1 %vm877_vm0, %v4831_v19 }
  0xbb   : > { %4594 = vmatmul.mubr.msk.bf16.gmra.mrb[80].mxu0 %vm877_vm0, %v4830_v20 }
  0xbc   : > { %4597 = vmatprep.mubr.msk.bf16.mxu0 %vm877_vm0, %v4833_v21  ;;  %4682 = vmatmul.mubr.msk.bf16.gmra.mrb[80].mxu1 %vm877_vm0, %v4832_v22 }
  0xc3   : > { %4598 = vmatmul.mubr.msk.bf16.gmra.mrb[84].mxu0 %vm877_vm0, %v4834_v23 }
  0xee   : > { %v4515_v25 = vpop.f32.mrb[0].mxu0 }
  0xef   : > { %v1866_v27 = vmul.f32 %v4515_v25, %v5187_v24  ;;  %v1170_v28 = vpop.f32.mrb[1].mxu0  ;;  %v4603_v31 = vpop.f32.mrb[0].mxu1 }
  0xf0   : > { %v1864_v29 = vmul.f32 %v5187_v24, %v1170_v28  ;;  %v4516_v30 = vpop.f32.mrb[2].mxu0  ;;  %v1954_v35 = vmul.f32 %v4603_v31, %v5187_v24  ;;  %v1522_v36 = vpop.f32.mrb[1].mxu1 }
  0xf1   : > { %v2045_v32 = vadd.f32 %v5192_v26, %v1866_v27  ;;  %v1867_v33 = vmul.f32 %v4516_v30, %v5187_v24  ;;  %v1173_v34 = vpop.f32.mrb[3].mxu0  ;;  %v1952_v39 = vmul.f32 %v5187_v24, %v1522_v36  ;;  %v4604_v40 = vpop.f32.mrb[2].mxu1 }
  0xf2   : > { %v2043_v37 = vadd.f32 %v5192_v26, %v1864_v29  ;;  %v1865_v38 = vmul.f32 %v5187_v24, %v1173_v34  ;;  %v2133_v42 = vadd.f32 %v5192_v26, %v1954_v35  ;;  %v1955_v43 = vmul.f32 %v4604_v40, %v5187_v24  ;;  %v1525_v44 = vpop.f32.mrb[3].mxu1 }
  0xf3   : > { %v2046_v41 = vadd.f32 %v5192_v26, %v1867_v33  ;;  %v2131_v46 = vadd.f32 %v5192_v26, %v1952_v39  ;;  %v1953_v47 = vmul.f32 %v5187_v24, %v1525_v44  ;;  %v2217_v48 = vmax.f32 %v2045_v32, 0.0 }
  0xf4   : > { %v2044_v45 = vadd.f32 %v5192_v26, %v1865_v38  ;;  %v2305_v50 = vmax.f32 %v2133_v42, 0.0  ;;  %v2134_v51 = vadd.f32 %v5192_v26, %v1955_v43  ;;  %v2215_v52 = vmax.f32 %v2043_v37, 0.0 }
  0xf5   : > { %v2218_v49 = vmax.f32 %v2046_v41, 0.0  ;;  %v2303_v54 = vmax.f32 %v2131_v46, 0.0  ;;  %v2132_v56 = vadd.f32 %v5192_v26, %v1953_v47 }
  0xf6   : > { %v2216_v53 = vmax.f32 %v2044_v45, 0.0  ;;  %v4519_v55 = vpop.f32.mrb[4].mxu0  ;;  %v2306_v58 = vmax.f32 %v2134_v51, 0.0 }
  0xf7   : > { %v3914_v57 = vpack.c.bf16 %v2218_v49, %v2217_v48  ;;  %v1870_v59 = vmul.f32 %v4519_v55, %v5187_v24  ;;  %v1186_v60 = vpop.f32.mrb[5].mxu0  ;;  %v2304_v62 = vmax.f32 %v2132_v56, 0.0  ;;  %v4607_v1 = vpop.f32.mrb[4].mxu1 }
  0xf8   : > { %v3909_v61 = vpack.c.bf16 %v2216_v53, %v2215_v52  ;;  %v1868_v63 = vmul.f32 %v5187_v24, %v1186_v60  ;;  %v4520_v0 = vpop.f32.mrb[6].mxu0  ;;  %v4134_v2 = vpack.c.bf16 %v2306_v58, %v2305_v50  ;;  %v1958_v6 = vmul.f32 %v4607_v1, %v5187_v24  ;;  %v1538_v7 = vpop.f32.mrb[5].mxu1 }
  0xf9   : > { %4336 = vst [vmem:[%s5215_s26 + $0x8] sm:$0xff] %v3914_v57   ;;  %v2049_v3 = vadd.f32 %v5192_v26, %v1870_v59  ;;  %v1871_v4 = vmul.f32 %v4520_v0, %v5187_v24  ;;  %v1189_v5 = vpop.f32.mrb[7].mxu0  ;;  %v4129_v8 = vpack.c.bf16 %v2304_v62, %v2303_v54  ;;  %v1956_v11 = vmul.f32 %v5187_v24, %v1538_v7  ;;  %v4608_v12 = vpop.f32.mrb[6].mxu1 }
  0xfa   : > { %3910 = vst [vmem:[%s5215_s26] sm:$0xff] %v3909_v61   ;;  %v2047_v9 = vadd.f32 %v5192_v26, %v1868_v63  ;;  %v1869_v10 = vmul.f32 %v5187_v24, %v1189_v5  ;;  %4380 = vst [vmem:[%s5215_s26 + $0x168] sm:$0xff] %v4134_v2   ;;  %v2137_v14 = vadd.f32 %v5192_v26, %v1958_v6  ;;  %v1541_v16 = vpop.f32.mrb[7].mxu1 }
  0xfb   : > { %v2050_v13 = vadd.f32 %v5192_v26, %v1871_v4  ;;  %v1959_v15 = vmul.f32 %v4608_v12, %v5187_v24  ;;  %4379 = vst [vmem:[%s5215_s26 + $0x160] sm:$0xff] %v4129_v8   ;;  %v2135_v18 = vadd.f32 %v5192_v26, %v1956_v11  ;;  %v1957_v19 = vmul.f32 %v5187_v24, %v1541_v16 }
  0xfc   : > { %v2048_v17 = vadd.f32 %v5192_v26, %v1869_v10  ;;  %v2221_v20 = vmax.f32 %v2049_v3, 0.0  ;;  %v2309_v22 = vmax.f32 %v2137_v14, 0.0  ;;  %v2219_v25 = vmax.f32 %v2047_v9, 0.0 }
  0xfd   : > { %v2222_v21 = vmax.f32 %v2050_v13, 0.0  ;;  %v2138_v23 = vadd.f32 %v5192_v26, %v1959_v15  ;;  %v2307_v28 = vmax.f32 %v2135_v18, 0.0  ;;  %v2136_v30 = vadd.f32 %v5192_v26, %v1957_v19 }
  0xfe   : > { %v2220_v27 = vmax.f32 %v2048_v17, 0.0  ;;  %v4523_v29 = vpop.f32.mrb[8].mxu0 }
  0xff   : > { %v3924_v31 = vpack.c.bf16 %v2222_v21, %v2221_v20  ;;  %v2310_v32 = vmax.f32 %v2138_v23, 0.0  ;;  %v1874_v33 = vmul.f32 %v4523_v29, %v5187_v24  ;;  %v1202_v34 = vpop.f32.mrb[9].mxu0  ;;  %v2308_v36 = vmax.f32 %v2136_v30, 0.0  ;;  %v4611_v39 = vpop.f32.mrb[8].mxu1 }
 0x100   : > { %v3919_v35 = vpack.c.bf16 %v2220_v27, %v2219_v25  ;;  %v1872_v37 = vmul.f32 %v5187_v24, %v1202_v34  ;;  %v4524_v38 = vpop.f32.mrb[10].mxu0  ;;  %v1962_v44 = vmul.f32 %v4611_v39, %v5187_v24  ;;  %v1554_v45 = vpop.f32.mrb[9].mxu1 }
 0x101   : > { %4338 = vst [vmem:[%s5215_s26 + $0x18] sm:$0xff] %v3924_v31   ;;  %v4144_v40 = vpack.c.bf16 %v2310_v32, %v2309_v22  ;;  %v2053_v41 = vadd.f32 %v5192_v26, %v1874_v33  ;;  %v1875_v42 = vmul.f32 %v4524_v38, %v5187_v24  ;;  %v1205_v43 = vpop.f32.mrb[11].mxu0  ;;  %v4139_v46 = vpack.c.bf16 %v2308_v36, %v2307_v28  ;;  %v4612_v50 = vpop.f32.mrb[10].mxu1 }
 0x102   : > { %4337 = vst [vmem:[%s5215_s26 + $0x10] sm:$0xff] %v3919_v35   ;;  %v2051_v47 = vadd.f32 %v5192_v26, %v1872_v37  ;;  %v1873_v48 = vmul.f32 %v5187_v24, %v1205_v43  ;;  %v1960_v49 = vmul.f32 %v5187_v24, %v1554_v45  ;;  %v2141_v52 = vadd.f32 %v5192_v26, %v1962_v44  ;;  %v1557_v54 = vpop.f32.mrb[11].mxu1 }
 0x103   : > { %4382 = vst [vmem:[%s5215_s26 + $0x178] sm:$0xff] %v4144_v40   ;;  %v2054_v51 = vadd.f32 %v5192_v26, %v1875_v42  ;;  %v1963_v53 = vmul.f32 %v4612_v50, %v5187_v24  ;;  %4381 = vst [vmem:[%s5215_s26 + $0x170] sm:$0xff] %v4139_v46   ;;  %v1961_v57 = vmul.f32 %v5187_v24, %v1557_v54  ;;  %v2225_v58 = vmax.f32 %v2053_v41, 0.0 }
 0x104   : > { %v2052_v55 = vadd.f32 %v5192_v26, %v1873_v48  ;;  %v2139_v56 = vadd.f32 %v5192_v26, %v1960_v49  ;;  %v2313_v60 = vmax.f32 %v2141_v52, 0.0  ;;  %v2223_v62 = vmax.f32 %v2051_v47, 0.0 }
 0x105   : > { %v2226_v59 = vmax.f32 %v2054_v51, 0.0  ;;  %v2142_v61 = vadd.f32 %v5192_v26, %v1963_v53  ;;  %v2140_v2 = vadd.f32 %v5192_v26, %v1961_v57 }
 0x106   : > { %v2224_v63 = vmax.f32 %v2052_v55, 0.0  ;;  %v2311_v0 = vmax.f32 %v2139_v56, 0.0  ;;  %v4527_v1 = vpop.f32.mrb[12].mxu0 }
 0x107   : > { %v3934_v3 = vpack.c.bf16 %v2226_v59, %v2225_v58  ;;  %v2314_v4 = vmax.f32 %v2142_v61, 0.0  ;;  %v1878_v5 = vmul.f32 %v4527_v1, %v5187_v24  ;;  %v1218_v6 = vpop.f32.mrb[13].mxu0  ;;  %v2312_v8 = vmax.f32 %v2140_v2, 0.0  ;;  %v4615_v11 = vpop.f32.mrb[12].mxu1 }
 0x108   : > { %v3929_v7 = vpack.c.bf16 %v2224_v63, %v2223_v62  ;;  %v1876_v9 = vmul.f32 %v5187_v24, %v1218_v6  ;;  %v4528_v10 = vpop.f32.mrb[14].mxu0  ;;  %v1966_v16 = vmul.f32 %v4615_v11, %v5187_v24  ;;  %v1570_v17 = vpop.f32.mrb[13].mxu1 }
 0x109   : > { %4340 = vst [vmem:[%s5215_s26 + $0x28] sm:$0xff] %v3934_v3   ;;  %v4154_v12 = vpack.c.bf16 %v2314_v4, %v2313_v60  ;;  %v2057_v13 = vadd.f32 %v5192_v26, %v1878_v5  ;;  %v1879_v14 = vmul.f32 %v4528_v10, %v5187_v24  ;;  %v1221_v15 = vpop.f32.mrb[15].mxu0  ;;  %v4149_v18 = vpack.c.bf16 %v2312_v8, %v2311_v0  ;;  %v4616_v22 = vpop.f32.mrb[14].mxu1 }
 0x10a   : > { %4339 = vst [vmem:[%s5215_s26 + $0x20] sm:$0xff] %v3929_v7   ;;  %v2055_v19 = vadd.f32 %v5192_v26, %v1876_v9  ;;  %v1877_v20 = vmul.f32 %v5187_v24, %v1221_v15  ;;  %v1964_v21 = vmul.f32 %v5187_v24, %v1570_v17  ;;  %v2145_v25 = vadd.f32 %v5192_v26, %v1966_v16  ;;  %v1573_v28 = vpop.f32.mrb[15].mxu1 }
 0x10b   : > { %4384 = vst [vmem:[%s5215_s26 + $0x188] sm:$0xff] %v4154_v12   ;;  %v2058_v23 = vadd.f32 %v5192_v26, %v1879_v14  ;;  %v1967_v27 = vmul.f32 %v4616_v22, %v5187_v24  ;;  %4383 = vst [vmem:[%s5215_s26 + $0x180] sm:$0xff] %v4149_v18   ;;  %v1965_v31 = vmul.f32 %v5187_v24, %v1573_v28  ;;  %v2229_v32 = vmax.f32 %v2057_v13, 0.0 }
 0x10c   : > { %v2056_v29 = vadd.f32 %v5192_v26, %v1877_v20  ;;  %v2143_v30 = vadd.f32 %v5192_v26, %v1964_v21  ;;  %v2317_v34 = vmax.f32 %v2145_v25, 0.0  ;;  %v2227_v36 = vmax.f32 %v2055_v19, 0.0 }
 0x10d   : > { %v2230_v33 = vmax.f32 %v2058_v23, 0.0  ;;  %v2146_v35 = vadd.f32 %v5192_v26, %v1967_v27  ;;  %v2144_v40 = vadd.f32 %v5192_v26, %v1965_v31 }
 0x10e   : > { %v2228_v37 = vmax.f32 %v2056_v29, 0.0  ;;  %v2315_v38 = vmax.f32 %v2143_v30, 0.0  ;;  %v4531_v39 = vpop.f32.mrb[16].mxu0 }
 0x10f   : > { %v3944_v41 = vpack.c.bf16 %v2230_v33, %v2229_v32  ;;  %v2318_v42 = vmax.f32 %v2146_v35, 0.0  ;;  %v1882_v43 = vmul.f32 %v4531_v39, %v5187_v24  ;;  %v1234_v44 = vpop.f32.mrb[17].mxu0  ;;  %v2316_v46 = vmax.f32 %v2144_v40, 0.0  ;;  %v4619_v49 = vpop.f32.mrb[16].mxu1 }
 0x110   : > { %v3939_v45 = vpack.c.bf16 %v2228_v37, %v2227_v36  ;;  %v1880_v47 = vmul.f32 %v5187_v24, %v1234_v44  ;;  %v4532_v48 = vpop.f32.mrb[18].mxu0  ;;  %v1970_v54 = vmul.f32 %v4619_v49, %v5187_v24  ;;  %v1586_v55 = vpop.f32.mrb[17].mxu1 }
 0x111   : > { %4342 = vst [vmem:[%s5215_s26 + $0x38] sm:$0xff] %v3944_v41   ;;  %v4164_v50 = vpack.c.bf16 %v2318_v42, %v2317_v34  ;;  %v2061_v51 = vadd.f32 %v5192_v26, %v1882_v43  ;;  %v1883_v52 = vmul.f32 %v4532_v48, %v5187_v24  ;;  %v1237_v53 = vpop.f32.mrb[19].mxu0  ;;  %v4159_v56 = vpack.c.bf16 %v2316_v46, %v2315_v38  ;;  %v4620_v60 = vpop.f32.mrb[18].mxu1 }
 0x112   : > { %4341 = vst [vmem:[%s5215_s26 + $0x30] sm:$0xff] %v3939_v45   ;;  %v2059_v57 = vadd.f32 %v5192_v26, %v1880_v47  ;;  %v1881_v58 = vmul.f32 %v5187_v24, %v1237_v53  ;;  %v1968_v59 = vmul.f32 %v5187_v24, %v1586_v55  ;;  %v2149_v62 = vadd.f32 %v5192_v26, %v1970_v54  ;;  %v1589_v0 = vpop.f32.mrb[19].mxu1 }
 0x113   : > { %4386 = vst [vmem:[%s5215_s26 + $0x198] sm:$0xff] %v4164_v50   ;;  %v2062_v61 = vadd.f32 %v5192_v26, %v1883_v52  ;;  %v1971_v63 = vmul.f32 %v4620_v60, %v5187_v24  ;;  %4385 = vst [vmem:[%s5215_s26 + $0x190] sm:$0xff] %v4159_v56   ;;  %v1969_v3 = vmul.f32 %v5187_v24, %v1589_v0  ;;  %v2233_v4 = vmax.f32 %v2061_v51, 0.0 }
 0x114   : > { %v2060_v1 = vadd.f32 %v5192_v26, %v1881_v58  ;;  %v2147_v2 = vadd.f32 %v5192_v26, %v1968_v59  ;;  %v2321_v6 = vmax.f32 %v2149_v62, 0.0  ;;  %v2231_v8 = vmax.f32 %v2059_v57, 0.0 }
 0x115   : > { %v2234_v5 = vmax.f32 %v2062_v61, 0.0  ;;  %v2150_v7 = vadd.f32 %v5192_v26, %v1971_v63  ;;  %v2148_v12 = vadd.f32 %v5192_v26, %v1969_v3 }
 0x116   : > { %v2232_v9 = vmax.f32 %v2060_v1, 0.0  ;;  %v2319_v10 = vmax.f32 %v2147_v2, 0.0  ;;  %v4535_v11 = vpop.f32.mrb[20].mxu0 }
 0x117   : > { %v3954_v13 = vpack.c.bf16 %v2234_v5, %v2233_v4  ;;  %v2322_v14 = vmax.f32 %v2150_v7, 0.0  ;;  %v1886_v15 = vmul.f32 %v4535_v11, %v5187_v24  ;;  %v1250_v16 = vpop.f32.mrb[21].mxu0  ;;  %v2320_v18 = vmax.f32 %v2148_v12, 0.0  ;;  %v4623_v21 = vpop.f32.mrb[20].mxu1 }
 0x118   : > { %v3949_v17 = vpack.c.bf16 %v2232_v9, %v2231_v8  ;;  %v1884_v19 = vmul.f32 %v5187_v24, %v1250_v16  ;;  %v4536_v20 = vpop.f32.mrb[22].mxu0  ;;  %v1974_v28 = vmul.f32 %v4623_v21, %v5187_v24  ;;  %v1602_v29 = vpop.f32.mrb[21].mxu1 }
 0x119   : > { %4344 = vst [vmem:[%s5215_s26 + $0x48] sm:$0xff] %v3954_v13   ;;  %v4174_v22 = vpack.c.bf16 %v2322_v14, %v2321_v6  ;;  %v2065_v23 = vadd.f32 %v5192_v26, %v1886_v15  ;;  %v1887_v25 = vmul.f32 %v4536_v20, %v5187_v24  ;;  %v1253_v27 = vpop.f32.mrb[23].mxu0  ;;  %v4169_v30 = vpack.c.bf16 %v2320_v18, %v2319_v10  ;;  %v4624_v34 = vpop.f32.mrb[22].mxu1 }
 0x11a   : > { %4343 = vst [vmem:[%s5215_s26 + $0x40] sm:$0xff] %v3949_v17   ;;  %v2063_v31 = vadd.f32 %v5192_v26, %v1884_v19  ;;  %v1885_v32 = vmul.f32 %v5187_v24, %v1253_v27  ;;  %v1972_v33 = vmul.f32 %v5187_v24, %v1602_v29  ;;  %v2153_v36 = vadd.f32 %v5192_v26, %v1974_v28  ;;  %v1605_v38 = vpop.f32.mrb[23].mxu1 }
 0x11b   : > { %4388 = vst [vmem:[%s5215_s26 + $0x1a8] sm:$0xff] %v4174_v22   ;;  %v2066_v35 = vadd.f32 %v5192_v26, %v1887_v25  ;;  %v1975_v37 = vmul.f32 %v4624_v34, %v5187_v24  ;;  %4387 = vst [vmem:[%s5215_s26 + $0x1a0] sm:$0xff] %v4169_v30   ;;  %v1973_v41 = vmul.f32 %v5187_v24, %v1605_v38  ;;  %v2237_v42 = vmax.f32 %v2065_v23, 0.0 }
 0x11c   : > { %v2064_v39 = vadd.f32 %v5192_v26, %v1885_v32  ;;  %v2151_v40 = vadd.f32 %v5192_v26, %v1972_v33  ;;  %v2325_v44 = vmax.f32 %v2153_v36, 0.0  ;;  %v2235_v46 = vmax.f32 %v2063_v31, 0.0 }
 0x11d   : > { %v2238_v43 = vmax.f32 %v2066_v35, 0.0  ;;  %v2154_v45 = vadd.f32 %v5192_v26, %v1975_v37  ;;  %v2152_v50 = vadd.f32 %v5192_v26, %v1973_v41 }
 0x11e   : > { %v2236_v47 = vmax.f32 %v2064_v39, 0.0  ;;  %v2323_v48 = vmax.f32 %v2151_v40, 0.0  ;;  %v4539_v49 = vpop.f32.mrb[24].mxu0 }
 0x11f   : > { %v3964_v51 = vpack.c.bf16 %v2238_v43, %v2237_v42  ;;  %v2326_v52 = vmax.f32 %v2154_v45, 0.0  ;;  %v1890_v53 = vmul.f32 %v4539_v49, %v5187_v24  ;;  %v1266_v54 = vpop.f32.mrb[25].mxu0  ;;  %v2324_v56 = vmax.f32 %v2152_v50, 0.0  ;;  %v4627_v59 = vpop.f32.mrb[24].mxu1 }
 0x120   : > { %v3959_v55 = vpack.c.bf16 %v2236_v47, %v2235_v46  ;;  %v1888_v57 = vmul.f32 %v5187_v24, %v1266_v54  ;;  %v4540_v58 = vpop.f32.mrb[26].mxu0  ;;  %v1978_v0 = vmul.f32 %v4627_v59, %v5187_v24  ;;  %v1618_v1 = vpop.f32.mrb[25].mxu1 }
 0x121   : > { %4346 = vst [vmem:[%s5215_s26 + $0x58] sm:$0xff] %v3964_v51   ;;  %v4184_v60 = vpack.c.bf16 %v2326_v52, %v2325_v44  ;;  %v2069_v61 = vadd.f32 %v5192_v26, %v1890_v53  ;;  %v1891_v62 = vmul.f32 %v4540_v58, %v5187_v24  ;;  %v1269_v63 = vpop.f32.mrb[27].mxu0  ;;  %v4179_v2 = vpack.c.bf16 %v2324_v56, %v2323_v48  ;;  %v4628_v6 = vpop.f32.mrb[26].mxu1 }
 0x122   : > { %4345 = vst [vmem:[%s5215_s26 + $0x50] sm:$0xff] %v3959_v55   ;;  %v2067_v3 = vadd.f32 %v5192_v26, %v1888_v57  ;;  %v1889_v4 = vmul.f32 %v5187_v24, %v1269_v63  ;;  %v1976_v5 = vmul.f32 %v5187_v24, %v1618_v1  ;;  %v2157_v8 = vadd.f32 %v5192_v26, %v1978_v0  ;;  %v1621_v10 = vpop.f32.mrb[27].mxu1 }
 0x123   : > { %4390 = vst [vmem:[%s5215_s26 + $0x1b8] sm:$0xff] %v4184_v60   ;;  %v2070_v7 = vadd.f32 %v5192_v26, %v1891_v62  ;;  %v1979_v9 = vmul.f32 %v4628_v6, %v5187_v24  ;;  %4389 = vst [vmem:[%s5215_s26 + $0x1b0] sm:$0xff] %v4179_v2   ;;  %v1977_v13 = vmul.f32 %v5187_v24, %v1621_v10  ;;  %v2241_v14 = vmax.f32 %v2069_v61, 0.0 }
 0x124   : > { %v2068_v11 = vadd.f32 %v5192_v26, %v1889_v4  ;;  %v2155_v12 = vadd.f32 %v5192_v26, %v1976_v5  ;;  %v2329_v16 = vmax.f32 %v2157_v8, 0.0  ;;  %v2239_v18 = vmax.f32 %v2067_v3, 0.0 }
 0x125   : > { %v2242_v15 = vmax.f32 %v2070_v7, 0.0  ;;  %v2158_v17 = vadd.f32 %v5192_v26, %v1979_v9  ;;  %v2156_v22 = vadd.f32 %v5192_v26, %v1977_v13 }
 0x126   : > { %v2240_v19 = vmax.f32 %v2068_v11, 0.0  ;;  %v2327_v20 = vmax.f32 %v2155_v12, 0.0  ;;  %v4543_v21 = vpop.f32.mrb[28].mxu0 }
 0x127   : > { %v3974_v23 = vpack.c.bf16 %v2242_v15, %v2241_v14  ;;  %v2330_v25 = vmax.f32 %v2158_v17, 0.0  ;;  %v1894_v27 = vmul.f32 %v4543_v21, %v5187_v24  ;;  %v1282_v28 = vpop.f32.mrb[29].mxu0  ;;  %v2328_v30 = vmax.f32 %v2156_v22, 0.0  ;;  %v4631_v33 = vpop.f32.mrb[28].mxu1 }
 0x128   : > { %v3969_v29 = vpack.c.bf16 %v2240_v19, %v2239_v18  ;;  %v1892_v31 = vmul.f32 %v5187_v24, %v1282_v28  ;;  %v4544_v32 = vpop.f32.mrb[30].mxu0  ;;  %v1982_v38 = vmul.f32 %v4631_v33, %v5187_v24  ;;  %v1634_v39 = vpop.f32.mrb[29].mxu1 }
 0x129   : > { %4348 = vst [vmem:[%s5215_s26 + $0x68] sm:$0xff] %v3974_v23   ;;  %v4194_v34 = vpack.c.bf16 %v2330_v25, %v2329_v16  ;;  %v2073_v35 = vadd.f32 %v5192_v26, %v1894_v27  ;;  %v1895_v36 = vmul.f32 %v4544_v32, %v5187_v24  ;;  %v1285_v37 = vpop.f32.mrb[31].mxu0  ;;  %v4189_v40 = vpack.c.bf16 %v2328_v30, %v2327_v20  ;;  %v4632_v44 = vpop.f32.mrb[30].mxu1 }
 0x12a   : > { %4347 = vst [vmem:[%s5215_s26 + $0x60] sm:$0xff] %v3969_v29   ;;  %v2071_v41 = vadd.f32 %v5192_v26, %v1892_v31  ;;  %v1893_v42 = vmul.f32 %v5187_v24, %v1285_v37  ;;  %v1980_v43 = vmul.f32 %v5187_v24, %v1634_v39  ;;  %v2161_v46 = vadd.f32 %v5192_v26, %v1982_v38  ;;  %v1637_v48 = vpop.f32.mrb[31].mxu1 }
 0x12b   : > { %4392 = vst [vmem:[%s5215_s26 + $0x1c8] sm:$0xff] %v4194_v34   ;;  %v2074_v45 = vadd.f32 %v5192_v26, %v1895_v36  ;;  %v1983_v47 = vmul.f32 %v4632_v44, %v5187_v24  ;;  %4391 = vst [vmem:[%s5215_s26 + $0x1c0] sm:$0xff] %v4189_v40   ;;  %v1981_v51 = vmul.f32 %v5187_v24, %v1637_v48  ;;  %v2245_v52 = vmax.f32 %v2073_v35, 0.0 }
 0x12c   : > { %v2072_v49 = vadd.f32 %v5192_v26, %v1893_v42  ;;  %v2159_v50 = vadd.f32 %v5192_v26, %v1980_v43  ;;  %v2333_v54 = vmax.f32 %v2161_v46, 0.0  ;;  %v2243_v56 = vmax.f32 %v2071_v41, 0.0 }
 0x12d   : > { %v2246_v53 = vmax.f32 %v2074_v45, 0.0  ;;  %v2162_v55 = vadd.f32 %v5192_v26, %v1983_v47  ;;  %v2160_v60 = vadd.f32 %v5192_v26, %v1981_v51 }
 0x12e   : > { %v2244_v57 = vmax.f32 %v2072_v49, 0.0  ;;  %v2331_v58 = vmax.f32 %v2159_v50, 0.0  ;;  %v4547_v59 = vpop.f32.mrb[32].mxu0 }
 0x12f   : > { %v3984_v61 = vpack.c.bf16 %v2246_v53, %v2245_v52  ;;  %v2334_v62 = vmax.f32 %v2162_v55, 0.0  ;;  %v1898_v63 = vmul.f32 %v4547_v59, %v5187_v24  ;;  %v1298_v0 = vpop.f32.mrb[33].mxu0  ;;  %v2332_v2 = vmax.f32 %v2160_v60, 0.0  ;;  %v4635_v5 = vpop.f32.mrb[32].mxu1 }
 0x130   : > { %v3979_v1 = vpack.c.bf16 %v2244_v57, %v2243_v56  ;;  %v1896_v3 = vmul.f32 %v5187_v24, %v1298_v0  ;;  %v4548_v4 = vpop.f32.mrb[34].mxu0  ;;  %v1986_v10 = vmul.f32 %v4635_v5, %v5187_v24  ;;  %v1650_v11 = vpop.f32.mrb[33].mxu1 }
 0x131   : > { %4350 = vst [vmem:[%s5215_s26 + $0x78] sm:$0xff] %v3984_v61   ;;  %v4204_v6 = vpack.c.bf16 %v2334_v62, %v2333_v54  ;;  %v2077_v7 = vadd.f32 %v5192_v26, %v1898_v63  ;;  %v1899_v8 = vmul.f32 %v4548_v4, %v5187_v24  ;;  %v1301_v9 = vpop.f32.mrb[35].mxu0  ;;  %v4199_v12 = vpack.c.bf16 %v2332_v2, %v2331_v58  ;;  %v4636_v16 = vpop.f32.mrb[34].mxu1 }
 0x132   : > { %4349 = vst [vmem:[%s5215_s26 + $0x70] sm:$0xff] %v3979_v1   ;;  %v2075_v13 = vadd.f32 %v5192_v26, %v1896_v3  ;;  %v1897_v14 = vmul.f32 %v5187_v24, %v1301_v9  ;;  %v1984_v15 = vmul.f32 %v5187_v24, %v1650_v11  ;;  %v2165_v18 = vadd.f32 %v5192_v26, %v1986_v10  ;;  %v1653_v20 = vpop.f32.mrb[35].mxu1 }
 0x133   : > { %4394 = vst [vmem:[%s5215_s26 + $0x1d8] sm:$0xff] %v4204_v6   ;;  %v2078_v17 = vadd.f32 %v5192_v26, %v1899_v8  ;;  %v1987_v19 = vmul.f32 %v4636_v16, %v5187_v24  ;;  %4393 = vst [vmem:[%s5215_s26 + $0x1d0] sm:$0xff] %v4199_v12   ;;  %v1985_v23 = vmul.f32 %v5187_v24, %v1653_v20  ;;  %v2249_v25 = vmax.f32 %v2077_v7, 0.0 }
 0x134   : > { %v2076_v21 = vadd.f32 %v5192_v26, %v1897_v14  ;;  %v2163_v22 = vadd.f32 %v5192_v26, %v1984_v15  ;;  %v2337_v28 = vmax.f32 %v2165_v18, 0.0  ;;  %v2247_v30 = vmax.f32 %v2075_v13, 0.0 }
 0x135   : > { %v2250_v27 = vmax.f32 %v2078_v17, 0.0  ;;  %v2166_v29 = vadd.f32 %v5192_v26, %v1987_v19  ;;  %v2164_v34 = vadd.f32 %v5192_v26, %v1985_v23 }
 0x136   : > { %v2248_v31 = vmax.f32 %v2076_v21, 0.0  ;;  %v2335_v32 = vmax.f32 %v2163_v22, 0.0  ;;  %v4551_v33 = vpop.f32.mrb[36].mxu0 }
 0x137   : > { %v3994_v35 = vpack.c.bf16 %v2250_v27, %v2249_v25  ;;  %v2338_v36 = vmax.f32 %v2166_v29, 0.0  ;;  %v1902_v37 = vmul.f32 %v4551_v33, %v5187_v24  ;;  %v1314_v38 = vpop.f32.mrb[37].mxu0  ;;  %v2336_v40 = vmax.f32 %v2164_v34, 0.0  ;;  %v4639_v43 = vpop.f32.mrb[36].mxu1 }
 0x138   : > { %v3989_v39 = vpack.c.bf16 %v2248_v31, %v2247_v30  ;;  %v1900_v41 = vmul.f32 %v5187_v24, %v1314_v38  ;;  %v4552_v42 = vpop.f32.mrb[38].mxu0  ;;  %v1990_v48 = vmul.f32 %v4639_v43, %v5187_v24  ;;  %v1666_v49 = vpop.f32.mrb[37].mxu1 }
 0x139   : > { %4352 = vst [vmem:[%s5215_s26 + $0x88] sm:$0xff] %v3994_v35   ;;  %v4214_v44 = vpack.c.bf16 %v2338_v36, %v2337_v28  ;;  %v2081_v45 = vadd.f32 %v5192_v26, %v1902_v37  ;;  %v1903_v46 = vmul.f32 %v4552_v42, %v5187_v24  ;;  %v1317_v47 = vpop.f32.mrb[39].mxu0  ;;  %v4209_v50 = vpack.c.bf16 %v2336_v40, %v2335_v32  ;;  %v4640_v54 = vpop.f32.mrb[38].mxu1 }
 0x13a   : > { %4351 = vst [vmem:[%s5215_s26 + $0x80] sm:$0xff] %v3989_v39   ;;  %v2079_v51 = vadd.f32 %v5192_v26, %v1900_v41  ;;  %v1901_v52 = vmul.f32 %v5187_v24, %v1317_v47  ;;  %v1988_v53 = vmul.f32 %v5187_v24, %v1666_v49  ;;  %v2169_v56 = vadd.f32 %v5192_v26, %v1990_v48  ;;  %v1669_v58 = vpop.f32.mrb[39].mxu1 }
 0x13b   : > { %4396 = vst [vmem:[%s5215_s26 + $0x1e8] sm:$0xff] %v4214_v44   ;;  %v2082_v55 = vadd.f32 %v5192_v26, %v1903_v46  ;;  %v1991_v57 = vmul.f32 %v4640_v54, %v5187_v24  ;;  %4395 = vst [vmem:[%s5215_s26 + $0x1e0] sm:$0xff] %v4209_v50   ;;  %v1989_v61 = vmul.f32 %v5187_v24, %v1669_v58  ;;  %v2253_v62 = vmax.f32 %v2081_v45, 0.0 }
 0x13c   : > { %v2080_v59 = vadd.f32 %v5192_v26, %v1901_v52  ;;  %v2167_v60 = vadd.f32 %v5192_v26, %v1988_v53  ;;  %v2341_v0 = vmax.f32 %v2169_v56, 0.0  ;;  %v2251_v2 = vmax.f32 %v2079_v51, 0.0 }
 0x13d   : > { %v2254_v63 = vmax.f32 %v2082_v55, 0.0  ;;  %v2170_v1 = vadd.f32 %v5192_v26, %v1991_v57  ;;  %v2168_v6 = vadd.f32 %v5192_v26, %v1989_v61 }
 0x13e   : > { %v2252_v3 = vmax.f32 %v2080_v59, 0.0  ;;  %v2339_v4 = vmax.f32 %v2167_v60, 0.0  ;;  %v4555_v5 = vpop.f32.mrb[40].mxu0 }
 0x13f   : > { %v4004_v7 = vpack.c.bf16 %v2254_v63, %v2253_v62  ;;  %v2342_v8 = vmax.f32 %v2170_v1, 0.0  ;;  %v1906_v9 = vmul.f32 %v4555_v5, %v5187_v24  ;;  %v1330_v10 = vpop.f32.mrb[41].mxu0  ;;  %v2340_v12 = vmax.f32 %v2168_v6, 0.0  ;;  %v4643_v15 = vpop.f32.mrb[40].mxu1 }
 0x140   : > { %v3999_v11 = vpack.c.bf16 %v2252_v3, %v2251_v2  ;;  %v1904_v13 = vmul.f32 %v5187_v24, %v1330_v10  ;;  %v4556_v14 = vpop.f32.mrb[42].mxu0  ;;  %v1994_v20 = vmul.f32 %v4643_v15, %v5187_v24  ;;  %v1682_v21 = vpop.f32.mrb[41].mxu1 }
 0x141   : > { %4354 = vst [vmem:[%s5215_s26 + $0x98] sm:$0xff] %v4004_v7   ;;  %v4224_v16 = vpack.c.bf16 %v2342_v8, %v2341_v0  ;;  %v2085_v17 = vadd.f32 %v5192_v26, %v1906_v9  ;;  %v1907_v18 = vmul.f32 %v4556_v14, %v5187_v24  ;;  %v1333_v19 = vpop.f32.mrb[43].mxu0  ;;  %v4219_v22 = vpack.c.bf16 %v2340_v12, %v2339_v4  ;;  %v4644_v28 = vpop.f32.mrb[42].mxu1 }
 0x142   : > { %4353 = vst [vmem:[%s5215_s26 + $0x90] sm:$0xff] %v3999_v11   ;;  %v2083_v23 = vadd.f32 %v5192_v26, %v1904_v13  ;;  %v1905_v25 = vmul.f32 %v5187_v24, %v1333_v19  ;;  %v1992_v27 = vmul.f32 %v5187_v24, %v1682_v21  ;;  %v2173_v30 = vadd.f32 %v5192_v26, %v1994_v20  ;;  %v1685_v32 = vpop.f32.mrb[43].mxu1 }
 0x143   : > { %4398 = vst [vmem:[%s5215_s26 + $0x1f8] sm:$0xff] %v4224_v16   ;;  %v2086_v29 = vadd.f32 %v5192_v26, %v1907_v18  ;;  %v1995_v31 = vmul.f32 %v4644_v28, %v5187_v24  ;;  %4397 = vst [vmem:[%s5215_s26 + $0x1f0] sm:$0xff] %v4219_v22   ;;  %v1993_v35 = vmul.f32 %v5187_v24, %v1685_v32  ;;  %v2257_v36 = vmax.f32 %v2085_v17, 0.0 }
 0x144   : > { %v2084_v33 = vadd.f32 %v5192_v26, %v1905_v25  ;;  %v2171_v34 = vadd.f32 %v5192_v26, %v1992_v27  ;;  %v2345_v38 = vmax.f32 %v2173_v30, 0.0  ;;  %v2255_v40 = vmax.f32 %v2083_v23, 0.0 }
 0x145   : > { %v2258_v37 = vmax.f32 %v2086_v29, 0.0  ;;  %v2174_v39 = vadd.f32 %v5192_v26, %v1995_v31  ;;  %v2172_v44 = vadd.f32 %v5192_v26, %v1993_v35 }
 0x146   : > { %v2256_v41 = vmax.f32 %v2084_v33, 0.0  ;;  %v2343_v42 = vmax.f32 %v2171_v34, 0.0  ;;  %v4559_v43 = vpop.f32.mrb[44].mxu0 }
 0x147   : > { %v4014_v45 = vpack.c.bf16 %v2258_v37, %v2257_v36  ;;  %v2346_v46 = vmax.f32 %v2174_v39, 0.0  ;;  %v1910_v47 = vmul.f32 %v4559_v43, %v5187_v24  ;;  %v1346_v48 = vpop.f32.mrb[45].mxu0  ;;  %v2344_v50 = vmax.f32 %v2172_v44, 0.0  ;;  %v4647_v53 = vpop.f32.mrb[44].mxu1 }
 0x148   : > { %v4009_v49 = vpack.c.bf16 %v2256_v41, %v2255_v40  ;;  %v1908_v51 = vmul.f32 %v5187_v24, %v1346_v48  ;;  %v4560_v52 = vpop.f32.mrb[46].mxu0  ;;  %v1998_v58 = vmul.f32 %v4647_v53, %v5187_v24  ;;  %v1698_v59 = vpop.f32.mrb[45].mxu1 }
 0x149   : > { %4356 = vst [vmem:[%s5215_s26 + $0xa8] sm:$0xff] %v4014_v45   ;;  %v4234_v54 = vpack.c.bf16 %v2346_v46, %v2345_v38  ;;  %v2089_v55 = vadd.f32 %v5192_v26, %v1910_v47  ;;  %v1911_v56 = vmul.f32 %v4560_v52, %v5187_v24  ;;  %v1349_v57 = vpop.f32.mrb[47].mxu0  ;;  %v4229_v60 = vpack.c.bf16 %v2344_v50, %v2343_v42  ;;  %v4648_v0 = vpop.f32.mrb[46].mxu1 }
 0x14a   : > { %4355 = vst [vmem:[%s5215_s26 + $0xa0] sm:$0xff] %v4009_v49   ;;  %v2087_v61 = vadd.f32 %v5192_v26, %v1908_v51  ;;  %v1909_v62 = vmul.f32 %v5187_v24, %v1349_v57  ;;  %v1996_v63 = vmul.f32 %v5187_v24, %v1698_v59  ;;  %v2177_v2 = vadd.f32 %v5192_v26, %v1998_v58  ;;  %v1701_v4 = vpop.f32.mrb[47].mxu1 }
 0x14b   : > { %4400 = vst [vmem:[%s5215_s26 + $0x208] sm:$0xff] %v4234_v54   ;;  %v2090_v1 = vadd.f32 %v5192_v26, %v1911_v56  ;;  %v1999_v3 = vmul.f32 %v4648_v0, %v5187_v24  ;;  %4399 = vst [vmem:[%s5215_s26 + $0x200] sm:$0xff] %v4229_v60   ;;  %v1997_v7 = vmul.f32 %v5187_v24, %v1701_v4  ;;  %v2261_v8 = vmax.f32 %v2089_v55, 0.0  ;;  %v5457_v54 = vld [vmem:[%s5699_s3] ss:$0 sm:$0xff] }
 0x14c   : > { %v2088_v5 = vadd.f32 %v5192_v26, %v1909_v62  ;;  %v2175_v6 = vadd.f32 %v5192_v26, %v1996_v63  ;;  %v2349_v10 = vmax.f32 %v2177_v2, 0.0  ;;  %v2259_v12 = vmax.f32 %v2087_v61, 0.0 }
 0x14d   : > { %v2262_v9 = vmax.f32 %v2090_v1, 0.0  ;;  %v2178_v11 = vadd.f32 %v5192_v26, %v1999_v3  ;;  %v2176_v16 = vadd.f32 %v5192_v26, %v1997_v7 }
 0x14e   : > { %v2260_v13 = vmax.f32 %v2088_v5, 0.0  ;;  %v2347_v14 = vmax.f32 %v2175_v6, 0.0  ;;  %v4563_v15 = vpop.f32.mrb[48].mxu0 }
 0x14f   : > { %v4024_v17 = vpack.c.bf16 %v2262_v9, %v2261_v8  ;;  %v2350_v18 = vmax.f32 %v2178_v11, 0.0  ;;  %v1914_v19 = vmul.f32 %v4563_v15, %v5187_v24  ;;  %v1362_v20 = vpop.f32.mrb[49].mxu0  ;;  %v2348_v22 = vmax.f32 %v2176_v16, 0.0  ;;  %v4651_v27 = vpop.f32.mrb[48].mxu1 }
 0x150   : > { %v4019_v21 = vpack.c.bf16 %v2260_v13, %v2259_v12  ;;  %v1912_v23 = vmul.f32 %v5187_v24, %v1362_v20  ;;  %v4564_v25 = vpop.f32.mrb[50].mxu0  ;;  %v2002_v32 = vmul.f32 %v4651_v27, %v5187_v24  ;;  %v1714_v33 = vpop.f32.mrb[49].mxu1 }
 0x151   : > { %4358 = vst [vmem:[%s5215_s26 + $0xb8] sm:$0xff] %v4024_v17   ;;  %v4244_v28 = vpack.c.bf16 %v2350_v18, %v2349_v10  ;;  %v2093_v29 = vadd.f32 %v5192_v26, %v1914_v19  ;;  %v1915_v30 = vmul.f32 %v4564_v25, %v5187_v24  ;;  %v1365_v31 = vpop.f32.mrb[51].mxu0  ;;  %v4239_v34 = vpack.c.bf16 %v2348_v22, %v2347_v14  ;;  %v4652_v38 = vpop.f32.mrb[50].mxu1 }
 0x152   : > { %4357 = vst [vmem:[%s5215_s26 + $0xb0] sm:$0xff] %v4019_v21   ;;  %v2091_v35 = vadd.f32 %v5192_v26, %v1912_v23  ;;  %v1913_v36 = vmul.f32 %v5187_v24, %v1365_v31  ;;  %v2000_v37 = vmul.f32 %v5187_v24, %v1714_v33  ;;  %v2181_v40 = vadd.f32 %v5192_v26, %v2002_v32  ;;  %v1717_v42 = vpop.f32.mrb[51].mxu1 }
 0x153   : > { %4402 = vst [vmem:[%s5215_s26 + $0x218] sm:$0xff] %v4244_v28   ;;  %v2094_v39 = vadd.f32 %v5192_v26, %v1915_v30  ;;  %v2003_v41 = vmul.f32 %v4652_v38, %v5187_v24  ;;  %4401 = vst [vmem:[%s5215_s26 + $0x210] sm:$0xff] %v4239_v34   ;;  %v2001_v45 = vmul.f32 %v5187_v24, %v1717_v42  ;;  %v2265_v46 = vmax.f32 %v2093_v29, 0.0  ;;  %v5463_v24 = vld [vmem:[%s5698_s2] ss:$0 sm:$0xff] }
 0x154   : > { %v2092_v43 = vadd.f32 %v5192_v26, %v1913_v36  ;;  %v2179_v44 = vadd.f32 %v5192_v26, %v2000_v37  ;;  %v2353_v48 = vmax.f32 %v2181_v40, 0.0  ;;  %v2263_v50 = vmax.f32 %v2091_v35, 0.0 }
 0x155   : > { %v2266_v47 = vmax.f32 %v2094_v39, 0.0  ;;  %v2182_v49 = vadd.f32 %v5192_v26, %v2003_v41  ;;  %v2180_v55 = vadd.f32 %v5457_v54, %v2001_v45 }
 0x156   : > { %v2264_v51 = vmax.f32 %v2092_v43, 0.0  ;;  %v2351_v52 = vmax.f32 %v2179_v44, 0.0  ;;  %v4567_v53 = vpop.f32.mrb[52].mxu0 }
 0x157   : > { %v4034_v56 = vpack.c.bf16 %v2266_v47, %v2265_v46  ;;  %v2354_v57 = vmax.f32 %v2182_v49, 0.0  ;;  %v1918_v26 = vmul.f32 %v5463_v24, %v4567_v53  ;;  %v1378_v58 = vpop.f32.mrb[53].mxu0  ;;  %v2352_v60 = vmax.f32 %v2180_v55, 0.0  ;;  %v4655_v63 = vpop.f32.mrb[52].mxu1 }
 0x158   : > { %v4029_v59 = vpack.c.bf16 %v2264_v51, %v2263_v50  ;;  %v1916_v61 = vmul.f32 %v5463_v24, %v1378_v58  ;;  %v4568_v62 = vpop.f32.mrb[54].mxu0  ;;  %v2006_v4 = vmul.f32 %v5463_v24, %v4655_v63  ;;  %v1730_v5 = vpop.f32.mrb[53].mxu1 }
 0x159   : > { %4360 = vst [vmem:[%s5215_s26 + $0xc8] sm:$0xff] %v4034_v56   ;;  %v4254_v0 = vpack.c.bf16 %v2354_v57, %v2353_v48  ;;  %v2097_v1 = vadd.f32 %v5457_v54, %v1918_v26  ;;  %v1919_v2 = vmul.f32 %v5463_v24, %v4568_v62  ;;  %v1381_v3 = vpop.f32.mrb[55].mxu0  ;;  %v4249_v6 = vpack.c.bf16 %v2352_v60, %v2351_v52  ;;  %v4656_v10 = vpop.f32.mrb[54].mxu1 }
 0x15a   : > { %4359 = vst [vmem:[%s5215_s26 + $0xc0] sm:$0xff] %v4029_v59   ;;  %v2095_v7 = vadd.f32 %v5457_v54, %v1916_v61  ;;  %v1917_v8 = vmul.f32 %v5463_v24, %v1381_v3  ;;  %v2004_v9 = vmul.f32 %v5463_v24, %v1730_v5  ;;  %v2185_v12 = vadd.f32 %v5457_v54, %v2006_v4  ;;  %v1733_v14 = vpop.f32.mrb[55].mxu1 }
 0x15b   : > { %4404 = vst [vmem:[%s5215_s26 + $0x228] sm:$0xff] %v4254_v0   ;;  %v2098_v11 = vadd.f32 %v5457_v54, %v1919_v2  ;;  %v2007_v13 = vmul.f32 %v5463_v24, %v4656_v10  ;;  %4403 = vst [vmem:[%s5215_s26 + $0x220] sm:$0xff] %v4249_v6   ;;  %v2005_v17 = vmul.f32 %v5463_v24, %v1733_v14  ;;  %v2269_v18 = vmax.f32 %v2097_v1, 0.0 }
 0x15c   : > { %v2096_v15 = vadd.f32 %v5457_v54, %v1917_v8  ;;  %v2183_v16 = vadd.f32 %v5457_v54, %v2004_v9  ;;  %v2357_v20 = vmax.f32 %v2185_v12, 0.0  ;;  %v2267_v22 = vmax.f32 %v2095_v7, 0.0 }
 0x15d   : > { %v2270_v19 = vmax.f32 %v2098_v11, 0.0  ;;  %v2186_v21 = vadd.f32 %v5457_v54, %v2007_v13  ;;  %v2184_v28 = vadd.f32 %v5457_v54, %v2005_v17 }
 0x15e   : > { %v2268_v23 = vmax.f32 %v2096_v15, 0.0  ;;  %v2355_v25 = vmax.f32 %v2183_v16, 0.0  ;;  %v4571_v27 = vpop.f32.mrb[56].mxu0 }
 0x15f   : > { %v4044_v29 = vpack.c.bf16 %v2270_v19, %v2269_v18  ;;  %v2358_v30 = vmax.f32 %v2186_v21, 0.0  ;;  %v1922_v31 = vmul.f32 %v5463_v24, %v4571_v27  ;;  %v1394_v32 = vpop.f32.mrb[57].mxu0  ;;  %v2356_v34 = vmax.f32 %v2184_v28, 0.0  ;;  %v4659_v37 = vpop.f32.mrb[56].mxu1 }
 0x160   : > { %v4039_v33 = vpack.c.bf16 %v2268_v23, %v2267_v22  ;;  %v1920_v35 = vmul.f32 %v5463_v24, %v1394_v32  ;;  %v4572_v36 = vpop.f32.mrb[58].mxu0  ;;  %v2010_v42 = vmul.f32 %v5463_v24, %v4659_v37  ;;  %v1746_v43 = vpop.f32.mrb[57].mxu1 }
 0x161   : > { %4362 = vst [vmem:[%s5215_s26 + $0xd8] sm:$0xff] %v4044_v29   ;;  %v4264_v38 = vpack.c.bf16 %v2358_v30, %v2357_v20  ;;  %v2101_v39 = vadd.f32 %v5457_v54, %v1922_v31  ;;  %v1923_v40 = vmul.f32 %v5463_v24, %v4572_v36  ;;  %v1397_v41 = vpop.f32.mrb[59].mxu0  ;;  %v4259_v44 = vpack.c.bf16 %v2356_v34, %v2355_v25  ;;  %v4660_v48 = vpop.f32.mrb[58].mxu1 }
 0x162   : > { %4361 = vst [vmem:[%s5215_s26 + $0xd0] sm:$0xff] %v4039_v33   ;;  %v2099_v45 = vadd.f32 %v5457_v54, %v1920_v35  ;;  %v1921_v46 = vmul.f32 %v5463_v24, %v1397_v41  ;;  %v2008_v47 = vmul.f32 %v5463_v24, %v1746_v43  ;;  %v2189_v50 = vadd.f32 %v5457_v54, %v2010_v42  ;;  %v1749_v52 = vpop.f32.mrb[59].mxu1 }
 0x163   : > { %4406 = vst [vmem:[%s5215_s26 + $0x238] sm:$0xff] %v4264_v38   ;;  %v2102_v49 = vadd.f32 %v5457_v54, %v1923_v40  ;;  %v2011_v51 = vmul.f32 %v5463_v24, %v4660_v48  ;;  %4405 = vst [vmem:[%s5215_s26 + $0x230] sm:$0xff] %v4259_v44   ;;  %v2009_v56 = vmul.f32 %v5463_v24, %v1749_v52  ;;  %v2273_v57 = vmax.f32 %v2101_v39, 0.0 }
 0x164   : > { %v2100_v53 = vadd.f32 %v5457_v54, %v1921_v46  ;;  %v2187_v55 = vadd.f32 %v5457_v54, %v2008_v47  ;;  %v2361_v58 = vmax.f32 %v2189_v50, 0.0  ;;  %v2271_v60 = vmax.f32 %v2099_v45, 0.0 }
 0x165   : > { %v2274_v26 = vmax.f32 %v2102_v49, 0.0  ;;  %v2190_v59 = vadd.f32 %v5457_v54, %v2011_v51  ;;  %v2188_v0 = vadd.f32 %v5457_v54, %v2009_v56 }
 0x166   : > { %v2272_v61 = vmax.f32 %v2100_v53, 0.0  ;;  %v2359_v62 = vmax.f32 %v2187_v55, 0.0  ;;  %v4575_v63 = vpop.f32.mrb[60].mxu0 }
 0x167   : > { %v4054_v1 = vpack.c.bf16 %v2274_v26, %v2273_v57  ;;  %v2362_v2 = vmax.f32 %v2190_v59, 0.0  ;;  %v1926_v3 = vmul.f32 %v5463_v24, %v4575_v63  ;;  %v1410_v4 = vpop.f32.mrb[61].mxu0  ;;  %v2360_v6 = vmax.f32 %v2188_v0, 0.0  ;;  %v4663_v9 = vpop.f32.mrb[60].mxu1 }
 0x168   : > { %v4049_v5 = vpack.c.bf16 %v2272_v61, %v2271_v60  ;;  %v1924_v7 = vmul.f32 %v5463_v24, %v1410_v4  ;;  %v4576_v8 = vpop.f32.mrb[62].mxu0  ;;  %v2014_v14 = vmul.f32 %v5463_v24, %v4663_v9  ;;  %v1762_v15 = vpop.f32.mrb[61].mxu1 }
 0x169   : > { %4364 = vst [vmem:[%s5215_s26 + $0xe8] sm:$0xff] %v4054_v1   ;;  %v4274_v10 = vpack.c.bf16 %v2362_v2, %v2361_v58  ;;  %v2105_v11 = vadd.f32 %v5457_v54, %v1926_v3  ;;  %v1927_v12 = vmul.f32 %v5463_v24, %v4576_v8  ;;  %v1413_v13 = vpop.f32.mrb[63].mxu0  ;;  %v4269_v16 = vpack.c.bf16 %v2360_v6, %v2359_v62  ;;  %v4664_v20 = vpop.f32.mrb[62].mxu1 }
 0x16a   : > { %4363 = vst [vmem:[%s5215_s26 + $0xe0] sm:$0xff] %v4049_v5   ;;  %v2103_v17 = vadd.f32 %v5457_v54, %v1924_v7  ;;  %v1925_v18 = vmul.f32 %v5463_v24, %v1413_v13  ;;  %v2012_v19 = vmul.f32 %v5463_v24, %v1762_v15  ;;  %v2193_v22 = vadd.f32 %v5457_v54, %v2014_v14  ;;  %v1765_v25 = vpop.f32.mrb[63].mxu1 }
 0x16b   : > { %4408 = vst [vmem:[%s5215_s26 + $0x248] sm:$0xff] %v4274_v10   ;;  %v2106_v21 = vadd.f32 %v5457_v54, %v1927_v12  ;;  %v2015_v23 = vmul.f32 %v5463_v24, %v4664_v20  ;;  %4407 = vst [vmem:[%s5215_s26 + $0x240] sm:$0xff] %v4269_v16   ;;  %v2013_v29 = vmul.f32 %v5463_v24, %v1765_v25  ;;  %v2277_v30 = vmax.f32 %v2105_v11, 0.0 }
 0x16c   : > { %v2104_v27 = vadd.f32 %v5457_v54, %v1925_v18  ;;  %v2191_v28 = vadd.f32 %v5457_v54, %v2012_v19  ;;  %v2365_v32 = vmax.f32 %v2193_v22, 0.0  ;;  %v2275_v34 = vmax.f32 %v2103_v17, 0.0 }
 0x16d   : > { %v2278_v31 = vmax.f32 %v2106_v21, 0.0  ;;  %v2194_v33 = vadd.f32 %v5457_v54, %v2015_v23  ;;  %v2192_v38 = vadd.f32 %v5457_v54, %v2013_v29 }
 0x16e   : > { %v2276_v35 = vmax.f32 %v2104_v27, 0.0  ;;  %v2363_v36 = vmax.f32 %v2191_v28, 0.0  ;;  %v4579_v37 = vpop.f32.mrb[64].mxu0 }
 0x16f   : > { %v4064_v39 = vpack.c.bf16 %v2278_v31, %v2277_v30  ;;  %v2366_v40 = vmax.f32 %v2194_v33, 0.0  ;;  %v1930_v41 = vmul.f32 %v5463_v24, %v4579_v37  ;;  %v1426_v42 = vpop.f32.mrb[65].mxu0  ;;  %v2364_v44 = vmax.f32 %v2192_v38, 0.0  ;;  %v4667_v47 = vpop.f32.mrb[64].mxu1 }
 0x170   : > { %v4059_v43 = vpack.c.bf16 %v2276_v35, %v2275_v34  ;;  %v1928_v45 = vmul.f32 %v5463_v24, %v1426_v42  ;;  %v4580_v46 = vpop.f32.mrb[66].mxu0  ;;  %v2018_v52 = vmul.f32 %v5463_v24, %v4667_v47  ;;  %v1778_v53 = vpop.f32.mrb[65].mxu1 }
 0x171   : > { %4366 = vst [vmem:[%s5215_s26 + $0xf8] sm:$0xff] %v4064_v39   ;;  %v4284_v48 = vpack.c.bf16 %v2366_v40, %v2365_v32  ;;  %v2109_v49 = vadd.f32 %v5457_v54, %v1930_v41  ;;  %v1931_v50 = vmul.f32 %v5463_v24, %v4580_v46  ;;  %v1429_v51 = vpop.f32.mrb[67].mxu0  ;;  %v4279_v55 = vpack.c.bf16 %v2364_v44, %v2363_v36  ;;  %v4668_v58 = vpop.f32.mrb[66].mxu1 }
 0x172   : > { %4365 = vst [vmem:[%s5215_s26 + $0xf0] sm:$0xff] %v4059_v43   ;;  %v2107_v56 = vadd.f32 %v5457_v54, %v1928_v45  ;;  %v1929_v57 = vmul.f32 %v5463_v24, %v1429_v51  ;;  %v2016_v26 = vmul.f32 %v5463_v24, %v1778_v53  ;;  %v2197_v60 = vadd.f32 %v5457_v54, %v2018_v52  ;;  %v1781_v62 = vpop.f32.mrb[67].mxu1 }
 0x173   : > { %4410 = vst [vmem:[%s5215_s26 + $0x258] sm:$0xff] %v4284_v48   ;;  %v2110_v59 = vadd.f32 %v5457_v54, %v1931_v50  ;;  %v2019_v61 = vmul.f32 %v5463_v24, %v4668_v58  ;;  %4409 = vst [vmem:[%s5215_s26 + $0x250] sm:$0xff] %v4279_v55   ;;  %v2017_v1 = vmul.f32 %v5463_v24, %v1781_v62  ;;  %v2281_v2 = vmax.f32 %v2109_v49, 0.0 }
 0x174   : > { %v2108_v63 = vadd.f32 %v5457_v54, %v1929_v57  ;;  %v2195_v0 = vadd.f32 %v5457_v54, %v2016_v26  ;;  %v2369_v4 = vmax.f32 %v2197_v60, 0.0  ;;  %v2279_v6 = vmax.f32 %v2107_v56, 0.0 }
 0x175   : > { %v2282_v3 = vmax.f32 %v2110_v59, 0.0  ;;  %v2198_v5 = vadd.f32 %v5457_v54, %v2019_v61  ;;  %v2196_v10 = vadd.f32 %v5457_v54, %v2017_v1 }
 0x176   : > { %v2280_v7 = vmax.f32 %v2108_v63, 0.0  ;;  %v2367_v8 = vmax.f32 %v2195_v0, 0.0  ;;  %v4583_v9 = vpop.f32.mrb[68].mxu0 }
 0x177   : > { %v4074_v11 = vpack.c.bf16 %v2282_v3, %v2281_v2  ;;  %v2370_v12 = vmax.f32 %v2198_v5, 0.0  ;;  %v1934_v13 = vmul.f32 %v5463_v24, %v4583_v9  ;;  %v1442_v14 = vpop.f32.mrb[69].mxu0  ;;  %v2368_v16 = vmax.f32 %v2196_v10, 0.0  ;;  %v4671_v19 = vpop.f32.mrb[68].mxu1 }
 0x178   : > { %v4069_v15 = vpack.c.bf16 %v2280_v7, %v2279_v6  ;;  %v1932_v17 = vmul.f32 %v5463_v24, %v1442_v14  ;;  %v4584_v18 = vpop.f32.mrb[70].mxu0  ;;  %v2022_v25 = vmul.f32 %v5463_v24, %v4671_v19  ;;  %v1794_v27 = vpop.f32.mrb[69].mxu1 }
 0x179   : > { %4368 = vst [vmem:[%s5215_s26 + $0x108] sm:$0xff] %v4074_v11   ;;  %v4294_v20 = vpack.c.bf16 %v2370_v12, %v2369_v4  ;;  %v2113_v21 = vadd.f32 %v5457_v54, %v1934_v13  ;;  %v1935_v22 = vmul.f32 %v5463_v24, %v4584_v18  ;;  %v1445_v23 = vpop.f32.mrb[71].mxu0  ;;  %v4289_v28 = vpack.c.bf16 %v2368_v16, %v2367_v8  ;;  %v4672_v32 = vpop.f32.mrb[70].mxu1 }
 0x17a   : > { %4367 = vst [vmem:[%s5215_s26 + $0x100] sm:$0xff] %v4069_v15   ;;  %v2111_v29 = vadd.f32 %v5457_v54, %v1932_v17  ;;  %v1933_v30 = vmul.f32 %v5463_v24, %v1445_v23  ;;  %v2020_v31 = vmul.f32 %v5463_v24, %v1794_v27  ;;  %v2201_v34 = vadd.f32 %v5457_v54, %v2022_v25  ;;  %v1797_v36 = vpop.f32.mrb[71].mxu1 }
 0x17b   : > { %4412 = vst [vmem:[%s5215_s26 + $0x268] sm:$0xff] %v4294_v20   ;;  %v2114_v33 = vadd.f32 %v5457_v54, %v1935_v22  ;;  %v2023_v35 = vmul.f32 %v5463_v24, %v4672_v32  ;;  %4411 = vst [vmem:[%s5215_s26 + $0x260] sm:$0xff] %v4289_v28   ;;  %v2021_v39 = vmul.f32 %v5463_v24, %v1797_v36  ;;  %v2285_v40 = vmax.f32 %v2113_v21, 0.0 }
 0x17c   : > { %v2112_v37 = vadd.f32 %v5457_v54, %v1933_v30  ;;  %v2199_v38 = vadd.f32 %v5457_v54, %v2020_v31  ;;  %v2373_v42 = vmax.f32 %v2201_v34, 0.0  ;;  %v2283_v44 = vmax.f32 %v2111_v29, 0.0 }
 0x17d   : > { %v2286_v41 = vmax.f32 %v2114_v33, 0.0  ;;  %v2202_v43 = vadd.f32 %v5457_v54, %v2023_v35  ;;  %v2200_v48 = vadd.f32 %v5457_v54, %v2021_v39 }
 0x17e   : > { %v2284_v45 = vmax.f32 %v2112_v37, 0.0  ;;  %v2371_v46 = vmax.f32 %v2199_v38, 0.0  ;;  %v4587_v47 = vpop.f32.mrb[72].mxu0 }
 0x17f   : > { %v4084_v49 = vpack.c.bf16 %v2286_v41, %v2285_v40  ;;  %v2374_v50 = vmax.f32 %v2202_v43, 0.0  ;;  %v1938_v51 = vmul.f32 %v5463_v24, %v4587_v47  ;;  %v1458_v52 = vpop.f32.mrb[73].mxu0  ;;  %v2372_v55 = vmax.f32 %v2200_v48, 0.0  ;;  %v4675_v26 = vpop.f32.mrb[72].mxu1 }
 0x180   : > { %v4079_v53 = vpack.c.bf16 %v2284_v45, %v2283_v44  ;;  %v1936_v56 = vmul.f32 %v5463_v24, %v1458_v52  ;;  %v4588_v57 = vpop.f32.mrb[74].mxu0  ;;  %v2026_v62 = vmul.f32 %v5463_v24, %v4675_v26  ;;  %v1810_v63 = vpop.f32.mrb[73].mxu1 }
 0x181   : > { %4370 = vst [vmem:[%s5215_s26 + $0x118] sm:$0xff] %v4084_v49   ;;  %v4304_v58 = vpack.c.bf16 %v2374_v50, %v2373_v42  ;;  %v2117_v59 = vadd.f32 %v5457_v54, %v1938_v51  ;;  %v1939_v60 = vmul.f32 %v5463_v24, %v4588_v57  ;;  %v1461_v61 = vpop.f32.mrb[75].mxu0  ;;  %v4299_v0 = vpack.c.bf16 %v2372_v55, %v2371_v46  ;;  %v4676_v4 = vpop.f32.mrb[74].mxu1 }
 0x182   : > { %4369 = vst [vmem:[%s5215_s26 + $0x110] sm:$0xff] %v4079_v53   ;;  %v2115_v1 = vadd.f32 %v5457_v54, %v1936_v56  ;;  %v1937_v2 = vmul.f32 %v5463_v24, %v1461_v61  ;;  %v2024_v3 = vmul.f32 %v5463_v24, %v1810_v63  ;;  %v2205_v6 = vadd.f32 %v5457_v54, %v2026_v62  ;;  %v1813_v8 = vpop.f32.mrb[75].mxu1 }
 0x183   : > { %4414 = vst [vmem:[%s5215_s26 + $0x278] sm:$0xff] %v4304_v58   ;;  %v2118_v5 = vadd.f32 %v5457_v54, %v1939_v60  ;;  %v2027_v7 = vmul.f32 %v5463_v24, %v4676_v4  ;;  %4413 = vst [vmem:[%s5215_s26 + $0x270] sm:$0xff] %v4299_v0   ;;  %v2025_v11 = vmul.f32 %v5463_v24, %v1813_v8  ;;  %v2289_v12 = vmax.f32 %v2117_v59, 0.0 }
 0x184   : > { %v2116_v9 = vadd.f32 %v5457_v54, %v1937_v2  ;;  %v2203_v10 = vadd.f32 %v5457_v54, %v2024_v3  ;;  %v2377_v14 = vmax.f32 %v2205_v6, 0.0  ;;  %v2287_v16 = vmax.f32 %v2115_v1, 0.0 }
 0x185   : > { %v2290_v13 = vmax.f32 %v2118_v5, 0.0  ;;  %v2206_v15 = vadd.f32 %v5457_v54, %v2027_v7  ;;  %v2204_v20 = vadd.f32 %v5457_v54, %v2025_v11 }
 0x186   : > { %v2288_v17 = vmax.f32 %v2116_v9, 0.0  ;;  %v2375_v18 = vmax.f32 %v2203_v10, 0.0  ;;  %v4591_v19 = vpop.f32.mrb[76].mxu0 }
 0x187   : > { %v4094_v21 = vpack.c.bf16 %v2290_v13, %v2289_v12  ;;  %v2378_v22 = vmax.f32 %v2206_v15, 0.0  ;;  %v1942_v23 = vmul.f32 %v5463_v24, %v4591_v19  ;;  %v1474_v25 = vpop.f32.mrb[77].mxu0  ;;  %v2376_v28 = vmax.f32 %v2204_v20, 0.0  ;;  %v4679_v31 = vpop.f32.mrb[76].mxu1 }
 0x188   : > { %v4089_v27 = vpack.c.bf16 %v2288_v17, %v2287_v16  ;;  %v1940_v29 = vmul.f32 %v5463_v24, %v1474_v25  ;;  %v4592_v30 = vpop.f32.mrb[78].mxu0  ;;  %v2030_v36 = vmul.f32 %v5463_v24, %v4679_v31  ;;  %v1826_v37 = vpop.f32.mrb[77].mxu1 }
 0x189   : > { %4372 = vst [vmem:[%s5215_s26 + $0x128] sm:$0xff] %v4094_v21   ;;  %v4314_v32 = vpack.c.bf16 %v2378_v22, %v2377_v14  ;;  %v2121_v33 = vadd.f32 %v5457_v54, %v1942_v23  ;;  %v1943_v34 = vmul.f32 %v5463_v24, %v4592_v30  ;;  %v1477_v35 = vpop.f32.mrb[79].mxu0  ;;  %v4309_v38 = vpack.c.bf16 %v2376_v28, %v2375_v18  ;;  %v4680_v42 = vpop.f32.mrb[78].mxu1 }
 0x18a   : > { %4371 = vst [vmem:[%s5215_s26 + $0x120] sm:$0xff] %v4089_v27   ;;  %v2119_v39 = vadd.f32 %v5457_v54, %v1940_v29  ;;  %v1941_v40 = vmul.f32 %v5463_v24, %v1477_v35  ;;  %v2028_v41 = vmul.f32 %v5463_v24, %v1826_v37  ;;  %v2209_v44 = vadd.f32 %v5457_v54, %v2030_v36  ;;  %v1829_v46 = vpop.f32.mrb[79].mxu1 }
 0x18b   : > { %4416 = vst [vmem:[%s5215_s26 + $0x288] sm:$0xff] %v4314_v32   ;;  %v2122_v43 = vadd.f32 %v5457_v54, %v1943_v34  ;;  %v2031_v45 = vmul.f32 %v5463_v24, %v4680_v42  ;;  %4415 = vst [vmem:[%s5215_s26 + $0x280] sm:$0xff] %v4309_v38   ;;  %v2029_v49 = vmul.f32 %v5463_v24, %v1829_v46  ;;  %v2293_v50 = vmax.f32 %v2121_v33, 0.0 }
 0x18c   : > { %v2120_v47 = vadd.f32 %v5457_v54, %v1941_v40  ;;  %v2207_v48 = vadd.f32 %v5457_v54, %v2028_v41  ;;  %v2381_v52 = vmax.f32 %v2209_v44, 0.0  ;;  %v2291_v55 = vmax.f32 %v2119_v39, 0.0 }
 0x18d   : > { %v2294_v51 = vmax.f32 %v2122_v43, 0.0  ;;  %v2210_v53 = vadd.f32 %v5457_v54, %v2031_v45  ;;  %v2208_v58 = vadd.f32 %v5457_v54, %v2029_v49 }
 0x18e   : > { %v2292_v56 = vmax.f32 %v2120_v47, 0.0  ;;  %v2379_v57 = vmax.f32 %v2207_v48, 0.0  ;;  %v4595_v26 = vpop.f32.mrb[80].mxu0 }
 0x18f   : > { %v4104_v59 = vpack.c.bf16 %v2294_v51, %v2293_v50  ;;  %v2382_v60 = vmax.f32 %v2210_v53, 0.0  ;;  %v1946_v61 = vmul.f32 %v5463_v24, %v4595_v26  ;;  %v1490_v62 = vpop.f32.mrb[81].mxu0  ;;  %v2380_v0 = vmax.f32 %v2208_v58, 0.0  ;;  %v4683_v3 = vpop.f32.mrb[80].mxu1 }
 0x190   : > { %v4099_v63 = vpack.c.bf16 %v2292_v56, %v2291_v55  ;;  %v1944_v1 = vmul.f32 %v5463_v24, %v1490_v62  ;;  %v4596_v2 = vpop.f32.mrb[82].mxu0  ;;  %v2034_v8 = vmul.f32 %v5463_v24, %v4683_v3  ;;  %v1842_v9 = vpop.f32.mrb[81].mxu1 }
 0x191   : > { %4374 = vst [vmem:[%s5215_s26 + $0x138] sm:$0xff] %v4104_v59   ;;  %v4324_v4 = vpack.c.bf16 %v2382_v60, %v2381_v52  ;;  %v2125_v5 = vadd.f32 %v5457_v54, %v1946_v61  ;;  %v1947_v6 = vmul.f32 %v5463_v24, %v4596_v2  ;;  %v1493_v7 = vpop.f32.mrb[83].mxu0  ;;  %v4319_v10 = vpack.c.bf16 %v2380_v0, %v2379_v57  ;;  %v4684_v14 = vpop.f32.mrb[82].mxu1 }
 0x192   : > { %4373 = vst [vmem:[%s5215_s26 + $0x130] sm:$0xff] %v4099_v63   ;;  %v2123_v11 = vadd.f32 %v5457_v54, %v1944_v1  ;;  %v1945_v12 = vmul.f32 %v5463_v24, %v1493_v7  ;;  %v2032_v13 = vmul.f32 %v5463_v24, %v1842_v9  ;;  %v2213_v16 = vadd.f32 %v5457_v54, %v2034_v8  ;;  %v1845_v18 = vpop.f32.mrb[83].mxu1 }
 0x193   : > { %4418 = vst [vmem:[%s5215_s26 + $0x298] sm:$0xff] %v4324_v4   ;;  %v2126_v15 = vadd.f32 %v5457_v54, %v1947_v6  ;;  %v2035_v17 = vmul.f32 %v5463_v24, %v4684_v14  ;;  %4417 = vst [vmem:[%s5215_s26 + $0x290] sm:$0xff] %v4319_v10   ;;  %v2033_v21 = vmul.f32 %v5463_v24, %v1845_v18  ;;  %v2297_v22 = vmax.f32 %v2125_v5, 0.0 }
 0x194   : > { %v2124_v19 = vadd.f32 %v5457_v54, %v1945_v12  ;;  %v2211_v20 = vadd.f32 %v5457_v54, %v2032_v13  ;;  %v2385_v25 = vmax.f32 %v2213_v16, 0.0  ;;  %v2295_v28 = vmax.f32 %v2123_v11, 0.0 }
 0x195   : > { %v2298_v23 = vmax.f32 %v2126_v15, 0.0  ;;  %v2214_v27 = vadd.f32 %v5457_v54, %v2035_v17  ;;  %v2212_v32 = vadd.f32 %v5457_v54, %v2033_v21 }
 0x196   : > { %v2296_v29 = vmax.f32 %v2124_v19, 0.0  ;;  %v2383_v30 = vmax.f32 %v2211_v20, 0.0  ;;  %v4599_v31 = vpop.f32.mrb[84].mxu0 }
 0x197   : > { %v4114_v33 = vpack.c.bf16 %v2298_v23, %v2297_v22  ;;  %v2386_v34 = vmax.f32 %v2214_v27, 0.0  ;;  %v1950_v35 = vmul.f32 %v5463_v24, %v4599_v31  ;;  %v1506_v36 = vpop.f32.mrb[85].mxu0  ;;  %v2384_v38 = vmax.f32 %v2212_v32, 0.0 }
 0x198   : > { %v4109_v37 = vpack.c.bf16 %v2296_v29, %v2295_v28  ;;  %v1948_v39 = vmul.f32 %v5463_v24, %v1506_v36  ;;  %v4600_v40 = vpop.f32.mrb[86].mxu0 }
 0x199   : > { %4376 = vst [vmem:[%s5215_s26 + $0x148] sm:$0xff] %v4114_v33   ;;  %v4334_v41 = vpack.c.bf16 %v2386_v34, %v2385_v25  ;;  %v2129_v42 = vadd.f32 %v5457_v54, %v1950_v35  ;;  %v1951_v43 = vmul.f32 %v5463_v24, %v4600_v40  ;;  %v1509_v44 = vpop.f32.mrb[87].mxu0  ;;  %v4329_v45 = vpack.c.bf16 %v2384_v38, %v2383_v30 }
 0x19a   : > { %4375 = vst [vmem:[%s5215_s26 + $0x140] sm:$0xff] %v4109_v37   ;;  %v2127_v46 = vadd.f32 %v5457_v54, %v1948_v39  ;;  %v1949_v47 = vmul.f32 %v5463_v24, %v1509_v44 }
 0x19b   : > { %4420 = vst [vmem:[%s5215_s26 + $0x2a8] sm:$0xff] %v4334_v41   ;;  %v2130_v48 = vadd.f32 %v5457_v54, %v1951_v43  ;;  %4419 = vst [vmem:[%s5215_s26 + $0x2a0] sm:$0xff] %v4329_v45   ;;  %v2301_v50 = vmax.f32 %v2129_v42, 0.0 }
 0x19c   : > { %v2128_v49 = vadd.f32 %v5457_v54, %v1949_v47  ;;  %v2299_v52 = vmax.f32 %v2127_v46, 0.0 }
 0x19d   : > { %v2302_v51 = vmax.f32 %v2130_v48, 0.0 }
 0x19e   : > { %v2300_v53 = vmax.f32 %v2128_v49, 0.0 }
 0x19f   : > { %v4124_v55 = vpack.c.bf16 %v2302_v51, %v2301_v50 }
 0x1a0   : > { %v4119_v24 = vpack.c.bf16 %v2300_v53, %v2299_v52 }
 0x1a1   : > { %4378 = vst [vmem:[%s5215_s26 + $0x158] sm:$0xff] %v4124_v55  }
 0x1a2   : > { %4377 = vst [vmem:[%s5215_s26 + $0x150] sm:$0xff] %v4119_v24  }
 0x1a3   : > { %4850 = shalt.err (!%p4847_p5)
}
 0x1a4   : > { %s4851_s22 = scalar_lea.hbm %s5642_s11, 11008  ;;  %s4855_s29 = scalar_lea.hbm %s5700_s4, 22016 }
 0x1a5   : > { %p4852_p6 = scmp.ne.s32.totalorder %s5642_s11, %s4851_s22  ;;  %p4856_p10 = scmp.lt.u32.totalorder %s5642_s11, %s5700_s4 }
 0x1a6   : > { %p4857_p11 = scmp.lt.u32.totalorder %s4855_s29, %s4851_s22  ;;  %p4859_p13 = scmp.lt.u32.totalorder %s4851_s22, %s5642_s11 }
 0x1a7   : > { %p4853_p7 = pnand %p4852_p6, %p4985_p4 }
 0x1a8   : > { %p4858_p12 = por %p4857_p11, %p4856_p10 }
 0x1a9   : > { %p4854_p9 = pneg %p4853_p7 }
 0x1aa   : > { %p4860_p0 = por %p4859_p13, %p4858_p12 }
 0x1ac   : > { %p4861_p1 = pnand %p4860_p0, %p4854_p9 }
 0x1ae   : > { %4864 = shalt.err (!%p4861_p1)
}
 0x1af   : > { %s4918_s6 = smov 64   ;;  %s4919_s7 = smov 4  }
 0x1b0   : > { %4690 = dma.vmem_to_hbm [thread:$0]  (%p4985_p4), %s5644_s8, 11008, %s5642_s11, %s5650_s18, %s4918_s6, %s4918_s6, %s4919_s7  }
 0x1b1 PF: > { %p4696_p2 = scmp.ge.s32.totalorder %s4915_s20, 2  ;;  %s3277_s9 = sand.u32 1, %s4895_s15  }
 0x1b2   : > { %s3278_s10 = scalar_lea.sflag [#allocation3], %s3277_s9 }
 0x1b3   : > { %p4693_p3 = pnand %p4696_p2, %p4992_p8 }
 0x1b5   : > { %4890 = dma.done.wait (!%p4693_p3), %s3278_s10, 11008  }
 0x1b6   : > { %4892 = vsyncadd (!%p4693_p3), %s3278_s10, 4294956288  ;;  %s17_s20 = sadd.s32 1, %s4915_s20   ;;  %s5703_s15 = smov %s4899_s16 }
 0x1b7   : > { %p14_p5 = scmp.ge.s32.totalorder %s17_s20, 4   ;;  %s5704_s16 = smov %s4903_s17 }
 0x1b8   : > { %s5705_s17 = smov %s4998_s28  ;;  %s5706_s18 = smov %s4911_s19 }
 0x1b9   : > { %s5707_s19 = smov %s5709_s23  ;;  %16 = sbr.rel (!%p14_p5) target bundleno = 4 (0x4), region = 80 }
 0x1c0   :  { %3283 = vsyncpa [#allocation3], 1 }
 0x1c1   :  { %3285 = vsyncpa [#allocation3 + $0x1], 1 }

</bundles_post_ra>
